<compile_context>
chip_gen: v6e
topology: v6e:2x2x1
jax: 0.10.0
libtpu: 0.0.40
codegen_flags: <defaults>
</compile_context>

<pallas_src>
import functools

import jax
import jax.numpy as jnp
from jax import lax
from jax.experimental import pallas as pl
from jax.experimental.pallas import tpu as pltpu


def _rstd_kernel(s_ref, x_ref, o_ref, *, dh, dw, w_c, use_highest):
    # s_ref: (dw, w_c, w_c*dw)  0/1 scatter matrices (constant block -> DMA'd once)
    # x_ref: (dh*dw, r_t, W)    all dh*dw input planes for this row tile
    # o_ref: (r_t, dh*W*dw)     output rows; lane dim = flattened (dhi, w, dwi)
    _, _, big_w = x_ref.shape
    precision = lax.Precision.HIGHEST if use_highest else lax.Precision.DEFAULT
    n_chunks = (big_w + w_c - 1) // w_c  # static

    # Fully static (Python-unrolled) loops: dh, dw and n_chunks are tiny.
    for dhi in range(dh):
        base = dhi * big_w * dw
        for m in range(n_chunks):
            w0 = m * w_c
            wc = min(w_c, big_w - w0)
            acc = None
            for dwi in range(dw):
                # (r_t, wc) chunk of one input plane.
                xk = x_ref[dhi * dw + dwi, :, w0:w0 + wc]
                # (wc, wc*dw) one-hot: column w' -> output lane w'*dw + dwi.
                s = s_ref[dwi, :wc, :wc * dw]
                p = jnp.dot(xk, s, precision=precision,
                            preferred_element_type=jnp.float32)
                acc = p if acc is None else acc + p  # disjoint supports: exact
            # Single write per output lane range (no init, no RMW).
            o_ref[:, base + w0 * dw: base + (w0 + wc) * dw] = acc.astype(o_ref.dtype)


def _sublane_multiple(dtype):
    itemsize = jnp.dtype(dtype).itemsize
    return {4: 8, 2: 16, 1: 32}.get(itemsize, 8)


def _pick_row_tile(rows, per_row_bytes, sub, budget_bytes):
    """Row tile that is a multiple of `sub` (or the full extent), fits the
    double-buffered VMEM budget, and divides `rows` when possible (otherwise a
    ragged cdiv grid is used; Pallas masks the out-of-bounds rows)."""
    max_rows = max(sub, min(1024, budget_bytes // max(per_row_bytes, 1)))
    divisors = [r for r in range(sub, rows + 1, sub)
                if rows % r == 0 and r <= max_rows]
    if divisors:
        return max(divisors)
    if rows <= max_rows:
        return rows  # full extent is always a legal block dim
    return max(sub, (max_rows // sub) * sub)


def image_decoder_patches(x, *, spatial_upsample=1, temporal_upsample=1):
    """Pallas implementation of ImageDecoderPatches.forward (rank-4 NCHW inputs)."""
    if x.ndim != 4:
        # TODO(synk): rank-5 (B, T, C, H, W) temporal path of reverse_space_to_depth.
        raise NotImplementedError("only the rank-4 (image) path is implemented")
    del temporal_upsample  # unused on the rank-4 path (matches PyTorch semantics)

    b, c_in, h, w = x.shape
    dh = dw = spatial_upsample
    if dh == 1:
        return x  # identity rearrange: skip the HBM round trip entirely

    if not jnp.issubdtype(x.dtype, jnp.floating):
        # TODO(synk): integer inputs need a non-MXU copy path (v7x MXU has no int).
        raise NotImplementedError("only floating-point inputs are supported")

    assert c_in % (dh * dw) == 0, "channels must be divisible by spatial_upsample**2"
    c_out = c_in // (dh * dw)
    itemsize = jnp.dtype(x.dtype).itemsize
    ow = dh * w * dw               # flattened (dhi, w, dwi) output lane extent
    rows = c_out * h               # merged (channel, row) axis

    # Lane-chunk width: each dot covers w_c*dw (<=256) output lanes, bounding
    # the copy cost at dw*w_c MACs per output element.
    w_c = max(1, min(w, 256 // dw))

    # Per-step VMEM: 2x double-buffered input block + 2x output block
    #   = 4 * r_t * (dh*dw*W) * itemsize   (+ the tiny scatter block).
    sub = _sublane_multiple(x.dtype)
    per_row = 4 * dh * dw * w * itemsize
    r_t = _pick_row_tile(rows, per_row, sub, budget_bytes=12 * 1024 * 1024)
    n_r = pl.cdiv(rows, r_t)

    # 0/1 scatter matrices S[dwi, w', o] = (o == w'*dw + dwi).  Built once per
    # call (tiny) and fetched into VMEM once (constant index_map below).
    w_ids = jnp.arange(w_c, dtype=jnp.int32)
    o_ids = jnp.arange(w_c * dw, dtype=jnp.int32)
    dwis = jnp.arange(dw, dtype=jnp.int32)
    scatter = (o_ids[None, None, :]
               == w_ids[None, :, None] * dw + dwis[:, None, None]).astype(x.dtype)

    # Free reshape: channel = (dhi*dw + dwi)*c_out + c, so splitting the channel
    # dim and merging (c_out, H) are metadata-only (same linear layout).
    x5 = x.reshape(b, dh * dw, rows, w)

    # bf16 through a 0/1 matmul is exact in a single MXU pass; f32/f16 need the
    # multi-pass HIGHEST path to stay an exact copy.
    use_highest = jnp.dtype(x.dtype) != jnp.bfloat16

    kernel = functools.partial(_rstd_kernel, dh=dh, dw=dw, w_c=w_c,
                               use_highest=use_highest)

    out3 = pl.pallas_call(
        kernel,
        out_shape=jax.ShapeDtypeStruct((b, rows, ow), x.dtype),
        grid=(b, n_r),
        in_specs=[
            # Scatter matrices: constant block index -> DMA'd once, reused.
            pl.BlockSpec((dw, w_c, w_c * dw), lambda bi, ri: (0, 0, 0)),
            # All dh*dw planes for this row tile.
            pl.BlockSpec((None, dh * dw, r_t, w), lambda bi, ri: (bi, 0, ri, 0)),
        ],
        # Lane-dense output rows (full-extent minor dim), written once per step.
        out_specs=pl.BlockSpec((None, r_t, ow), lambda bi, ri: (bi, ri, 0)),
        compiler_params=pltpu.CompilerParams(
            dimension_semantics=("parallel", "parallel"),
            vmem_limit_bytes=32 * 1024 * 1024,
        ),
        cost_estimate=pl.CostEstimate(
            flops=x.size,  # logically a copy: advertise it as bandwidth-bound
            transcendentals=0,
            bytes_accessed=2 * x.size * itemsize + scatter.size * itemsize,
        ),
    )(scatter, x5)

    # Free reshape: (B, c_out*H, dh*W*dw) and (B, c_out, H*dh, W*dw) share the
    # same linear layout (b, c, h, dhi, w, dwi), so this is metadata-only.
    return out3.reshape(b, c_out, h * dh, w * dw)


if __name__ == "__main__":
    key = jax.random.PRNGKey(0)

    B, C, H, W = 2, 4, 16, 16
    spatial_upsample = 2
    dh = dw = spatial_upsample
    c_in = C * spatial_upsample * spatial_upsample  # 16

    # --- f32 path (HIGHEST-precision exact MXU copy) ---
    x = jax.random.normal(key, (B, c_in, H, W), dtype=jnp.float32)
    out = image_decoder_patches(
        x, spatial_upsample=spatial_upsample, temporal_upsample=1)
    out = jax.block_until_ready(out)

    # Pure-JAX reference of einops "b (dh dw c) h w -> b c (h dh) (w dw)"
    ref = x.reshape(B, dh, dw, C, H, W)
    ref = jnp.transpose(ref, (0, 3, 4, 1, 5, 2)).reshape(B, C, H * dh, W * dw)

    assert out.shape == (B, C, H * dh, W * dw), out.shape
    assert out.dtype == x.dtype
    # HIGHEST keeps the 0/1 matmul an exact copy; the tolerance only guards
    # against MXU pass-count differences across TPU generations.
    assert bool(jnp.allclose(out, ref, rtol=1e-4, atol=1e-5)), "f32 mismatch"

    # --- bf16 path (single-pass DEFAULT-precision MXU copy, exact for bf16) ---
    xb = x.astype(jnp.bfloat16)
    outb = jax.block_until_ready(
        image_decoder_patches(xb, spatial_upsample=spatial_upsample))
    refb = xb.reshape(B, dh, dw, C, H, W)
    refb = jnp.transpose(refb, (0, 3, 4, 1, 5, 2)).reshape(B, C, H * dh, W * dw)
    assert outb.dtype == jnp.bfloat16
    assert bool(jnp.allclose(outb.astype(jnp.float32), refb.astype(jnp.float32),
                             rtol=1e-2, atol=1e-2)), "bf16 mismatch"

    print("KERNEL_OK")
</pallas_src>

<mosaic_0001>
module attributes {stable_mosaic.version = 11 : i64} {
  func.func @_rstd_kernel(%arg0: i32, %arg1: i32, %arg2: memref<2x16x32xf32, #tpu.memory_space<vmem>>, %arg3: memref<1x4x64x16xf32, #tpu.memory_space<vmem>>, %arg4: memref<1x64x64xf32, #tpu.memory_space<vmem>>) attributes {dimension_semantics = [#tpu.dimension_semantics<parallel>, #tpu.dimension_semantics<parallel>], iteration_bounds = array<i64: 2, 1>, scalar_prefetch = 0 : i64, scratch_operands = 0 : i64, tpu.core_type = #tpu.core_type<tc>, window_params = [{pipeline_mode = #tpu.pipeline_mode<synchronous>, transform_indices = @transform_0, window_bounds = array<i64: 2, 16, 32>}, {transform_indices = @transform_1, window_bounds = array<i64: 1, 4, 64, 16>}, {transform_indices = @transform_2, window_bounds = array<i64: 1, 64, 64>}]} {
    %c0 = arith.constant 0 : index
    %c0_0 = arith.constant 0 : index
    %c0_1 = arith.constant 0 : index
    %c0_2 = arith.constant 0 : index
    %0 = vector.load %arg3[%c0, %c0_0, %c0_1, %c0_2] : memref<1x4x64x16xf32, #tpu.memory_space<vmem>>, vector<1x1x64x16xf32>
    %1 = vector.shape_cast %0 : vector<1x1x64x16xf32> to vector<64x16xf32>
    %c0_3 = arith.constant 0 : index
    %c0_4 = arith.constant 0 : index
    %c0_5 = arith.constant 0 : index
    %2 = vector.load %arg2[%c0_3, %c0_4, %c0_5] : memref<2x16x32xf32, #tpu.memory_space<vmem>>, vector<1x16x32xf32>
    %3 = vector.shape_cast %2 : vector<1x16x32xf32> to vector<16x32xf32>
    %cst = arith.constant dense<0.000000e+00> : vector<64x32xf32>
    %4 = tpu.matmul %1, %3, %cst {dimension_numbers = #tpu.dot_dimension_numbers<[1], [0], [0], [1], [0, 0, 1, 1], [], []>, precision = #tpu.contract_precision<fp32>} : vector<64x16xf32>, vector<16x32xf32>, vector<64x32xf32> -> vector<64x32xf32>
    %c0_6 = arith.constant 0 : index
    %c1 = arith.constant 1 : index
    %c0_7 = arith.constant 0 : index
    %c0_8 = arith.constant 0 : index
    %5 = vector.load %arg3[%c0_6, %c1, %c0_7, %c0_8] : memref<1x4x64x16xf32, #tpu.memory_space<vmem>>, vector<1x1x64x16xf32>
    %6 = vector.shape_cast %5 : vector<1x1x64x16xf32> to vector<64x16xf32>
    %c1_9 = arith.constant 1 : index
    %c0_10 = arith.constant 0 : index
    %c0_11 = arith.constant 0 : index
    %7 = vector.load %arg2[%c1_9, %c0_10, %c0_11] : memref<2x16x32xf32, #tpu.memory_space<vmem>>, vector<1x16x32xf32>
    %8 = vector.shape_cast %7 : vector<1x16x32xf32> to vector<16x32xf32>
    %cst_12 = arith.constant dense<0.000000e+00> : vector<64x32xf32>
    %9 = tpu.matmul %6, %8, %cst_12 {dimension_numbers = #tpu.dot_dimension_numbers<[1], [0], [0], [1], [0, 0, 1, 1], [], []>, precision = #tpu.contract_precision<fp32>} : vector<64x16xf32>, vector<16x32xf32>, vector<64x32xf32> -> vector<64x32xf32>
    %10 = arith.addf %4, %9 : vector<64x32xf32>
    %c0_13 = arith.constant 0 : index
    %c0_14 = arith.constant 0 : index
    %c0_15 = arith.constant 0 : index
    %11 = vector.load %arg4[%c0_13, %c0_14, %c0_15] : memref<1x64x64xf32, #tpu.memory_space<vmem>>, vector<1x64x32xf32>
    %12 = vector.shape_cast %11 : vector<1x64x32xf32> to vector<64x32xf32>
    %13 = vector.shape_cast %10 : vector<64x32xf32> to vector<1x64x32xf32>
    tpu.vector_store %arg4[%c0_13, %c0_14, %c0_15], %13 {strides = array<i32>} : memref<1x64x64xf32, #tpu.memory_space<vmem>>, vector<1x64x32xf32>,
    %c0_16 = arith.constant 0 : index
    %c2 = arith.constant 2 : index
    %c0_17 = arith.constant 0 : index
    %c0_18 = arith.constant 0 : index
    %14 = vector.load %arg3[%c0_16, %c2, %c0_17, %c0_18] : memref<1x4x64x16xf32, #tpu.memory_space<vmem>>, vector<1x1x64x16xf32>
    %15 = vector.shape_cast %14 : vector<1x1x64x16xf32> to vector<64x16xf32>
    %c0_19 = arith.constant 0 : index
    %c0_20 = arith.constant 0 : index
    %c0_21 = arith.constant 0 : index
    %16 = vector.load %arg2[%c0_19, %c0_20, %c0_21] : memref<2x16x32xf32, #tpu.memory_space<vmem>>, vector<1x16x32xf32>
    %17 = vector.shape_cast %16 : vector<1x16x32xf32> to vector<16x32xf32>
    %cst_22 = arith.constant dense<0.000000e+00> : vector<64x32xf32>
    %18 = tpu.matmul %15, %17, %cst_22 {dimension_numbers = #tpu.dot_dimension_numbers<[1], [0], [0], [1], [0, 0, 1, 1], [], []>, precision = #tpu.contract_precision<fp32>} : vector<64x16xf32>, vector<16x32xf32>, vector<64x32xf32> -> vector<64x32xf32>
    %c0_23 = arith.constant 0 : index
    %c3 = arith.constant 3 : index
    %c0_24 = arith.constant 0 : index
    %c0_25 = arith.constant 0 : index
    %19 = vector.load %arg3[%c0_23, %c3, %c0_24, %c0_25] : memref<1x4x64x16xf32, #tpu.memory_space<vmem>>, vector<1x1x64x16xf32>
    %20 = vector.shape_cast %19 : vector<1x1x64x16xf32> to vector<64x16xf32>
    %c1_26 = arith.constant 1 : index
    %c0_27 = arith.constant 0 : index
    %c0_28 = arith.constant 0 : index
    %21 = vector.load %arg2[%c1_26, %c0_27, %c0_28] : memref<2x16x32xf32, #tpu.memory_space<vmem>>, vector<1x16x32xf32>
    %22 = vector.shape_cast %21 : vector<1x16x32xf32> to vector<16x32xf32>
    %cst_29 = arith.constant dense<0.000000e+00> : vector<64x32xf32>
    %23 = tpu.matmul %20, %22, %cst_29 {dimension_numbers = #tpu.dot_dimension_numbers<[1], [0], [0], [1], [0, 0, 1, 1], [], []>, precision = #tpu.contract_precision<fp32>} : vector<64x16xf32>, vector<16x32xf32>, vector<64x32xf32> -> vector<64x32xf32>
    %24 = arith.addf %18, %23 : vector<64x32xf32>
    %c0_30 = arith.constant 0 : index
    %c0_31 = arith.constant 0 : index
    %c32 = arith.constant 32 : index
    %25 = vector.load %arg4[%c0_30, %c0_31, %c32] : memref<1x64x64xf32, #tpu.memory_space<vmem>>, vector<1x64x32xf32>
    %26 = vector.shape_cast %25 : vector<1x64x32xf32> to vector<64x32xf32>
    %27 = vector.shape_cast %24 : vector<64x32xf32> to vector<1x64x32xf32>
    tpu.vector_store %arg4[%c0_30, %c0_31, %c32], %27 {strides = array<i32>} : memref<1x64x64xf32, #tpu.memory_space<vmem>>, vector<1x64x32xf32>,
    return
  }
  func.func @transform_0(%arg0: i32, %arg1: i32) -> (i32, i32, i32) {
    %c0_i32 = arith.constant 0 : i32
    %c0_i32_0 = arith.constant 0 : i32
    %c0_i32_1 = arith.constant 0 : i32
    %c0_i32_2 = arith.constant 0 : i32
    return %c0_i32, %c0_i32_0, %c0_i32_1 : i32, i32, i32
  }
  func.func @transform_1(%arg0: i32, %arg1: i32) -> (i32, i32, i32, i32) {
    %c0_i32 = arith.constant 0 : i32
    %c0_i32_0 = arith.constant 0 : i32
    %c0_i32_1 = arith.constant 0 : i32
    return %arg0, %c0_i32, %arg1, %c0_i32_0 : i32, i32, i32, i32
  }
  func.func @transform_2(%arg0: i32, %arg1: i32) -> (i32, i32, i32) {
    %c0_i32 = arith.constant 0 : i32
    %c0_i32_0 = arith.constant 0 : i32
    return %arg0, %arg1, %c0_i32 : i32, i32, i32
  }
}

</mosaic_0001>

<bundles_post_ra>
// kernel: tpu_custom_call.1
= control target key start
LH: loop header
LB: loop body
LE: loop exit
PB: predicated region body
PF: predicated region fallthrough
CT: control target
= control target key end

     0   :  { %7 = vsyncpa [#allocation3], 0  ;;  %s5404_s0 = inlined_call_operand.vmem [shape: f32[2,16,32], index: 0, kind: input, shape index: {}]   ;;  %s5405_s1 = inlined_call_operand.vmem [shape: f32[2,4,64,16], index: 1, kind: input, shape index: {}]   ;;  %s5406_s2 = inlined_call_operand.hbm [shape: f32[2,64,64], index: 2, kind: output, shape index: {}]  }
   0x1   :  { %9 = vsyncpa [#allocation3 + $0x1], 0  ;;  %s4321_s9 = smov 0   ;;  %s4323_s10 = smov 0  }
   0x2   :  { %s4325_s11 = smov 0   ;;  %s4327_s12 = smov 0  }
   0x3   :  { %s4329_s13 = smov 0   ;;  %s4331_s14 = smov 0  }
   0x4 LB: > { %s3499_s15 = sadd.s32 4294967295, %s4300_s14   ;;  %s3500_s16 = sadd.s32 4294967294, %s4300_s14   ;;  %s4300_s14 = sphi %s4331_s14, %s15_s14   ;;  %s4296_s13 = sphi %s4329_s13, %s5445_s13   ;;  %s4292_s12 = sphi %s4327_s12, %s5444_s12   ;;  %s4288_s11 = sphi %s4325_s11, %s5443_s11   ;;  %s4284_s10 = sphi %s4323_s10, %s5442_s10   ;;  %s4280_s9 = sphi %s4321_s9, %s5441_s9  }
   0x5   : > { %s27_s17 = sadd.s32 1, %s4296_s13  ;;  %s85_s18 = sadd.s32 1, %s4288_s11 }
   0x6   : > { %p29_p0 = scmp.ge.s32.totalorder %s27_s17, 2  ;;  %p95_p1 = scmp.ne.s32.totalorder %s4288_s11, %s4284_s10 }
   0x7   : > { %p96_p2 = scmp.eq.s32.totalorder %s3499_s15, 1  ;;  %p101_p3 = scmp.ne.s32.totalorder %s4284_s10, %s4280_s9 }
   0x8   : > { %s5447_s17 = smov (%p29_p0, %s27_s17), 0  ;;  %p102_p5 = scmp.eq.s32.totalorder %s3500_s16, 1 }
   0x9   : > { %p4361_p4 = por %p96_p2, %p95_p1  ;;  %s80_s20 = ssub.s32 %s4296_s13, %s5447_s17 }
   0xa   : > { %p3503_p6 = scmp.ge.s32.totalorder %s4300_s14, 1  ;;  %p83_p7 = scmp.eq.s32.totalorder %s80_s20, 0 }
   0xb   : > { %p4368_p8 = por %p102_p5, %p101_p3  ;;  %p136_p9 = scmp.lt.s32.totalorder %s4300_s14, 3 }
   0xc   : > { %s4374_s22 = scalar_select %p83_p7, %s4288_s11, %s85_s18  }
   0xd   : > { %p137_p10 = pnand %p3503_p6, %p136_p9 }
   0xf   : > { %140 = sbr.rel (%p137_p10) target bundleno = 557 (0x22d), region = 28 }
  0x14   : > { %v3516_v0 = vld [vmem:[%s5404_s0 + $0x18] sm:$0xff]  ;;  %v3515_v1 = vld [vmem:[%s5404_s0 + $0x10] sm:$0xff]  ;;  %p163_p11 = scmp.lt.s32.totalorder %s4292_s12, 1  ;;  %vm195_vm0 = vcmask 130048   ;;  %v182_v52 = vld [vmem:[%s5404_s0 + $0x8] sm:$0xff]  ;;  %s159_s8 = sand.u32 1, %s4284_s10  }
  0x15   : > { %v4383_v2 = vand.u32 4294901760, %v3516_v0  ;;  %v4385_v3 = vand.u32 4294901760, %v3515_v1  ;;  %v4508_v60 = vand.u32 4294901760, %v182_v52  ;;  %s3504_s15 = sshll.u32 %s159_s8, 6  ;;  %vm1764_vm1 = vcmask 261120   ;;  %s4302_s18 = smov 32  }
  0x16   : > { %s164_s27 = scalar_select %p163_p11, %s4292_s12, 1  ;;  %vm3395_vm2 = vcmask 523520  }
  0x17   : > { %3782 = vmatprep.subr.mxu0 %v4383_v2  ;;  %v4390_v4 = vsub.f32 %v3516_v0, %v4383_v2  ;;  %v4393_v5 = vsub.f32 %v3515_v1, %v4385_v3  ;;  %s5169_s16 = scalar_lea.vmem [#allocation2], %s3504_s15  ;;  %s3541_s20 = sshll.u32 %s4292_s12, 10 }
  0x18   : > { %3783 = vmatpush3.msra.mxu0 %v4383_v2  ;;  %s3540_s28 = sshll.u32 %s164_s27, 8  ;;  %s3420_s23 = sshll.u32 %s5169_s16, 4  ;;  %s5351_s23 = int_to_ptr.vmem [resolvable:$true] %s3420_s23 }
  0x19   : > { %v4397_v6 = vand.u32 4294901760, %v4390_v4  ;;  %3784 = vmatprep.subr.mxu0 %v4385_v3  ;;  %v4401_v7 = vand.u32 4294901760, %v4393_v5  ;;  %s4406_s3 = scalar_lea.vmem %s5405_s1, %s3540_s28  ;;  %s5349_s26 = scalar_lea.hbm %s5406_s2, %s3541_s20 }
  0x1a   : > { %3785 = vmatpush3.msra.mxu0 %v4385_v3  ;;  %v3507_v8 = vld [vmem:[%s4406_s3 + $0x40] sm:$0xff]  ;;  %v3508_v9 = vld [vmem:[%s4406_s3 + $0x48] sm:$0xff]  ;;  %v3509_v10 = vld [vmem:[%s4406_s3 + $0x50] sm:$0xff]  ;;  %s5359_s12 = scalar_lea.sflag [#allocation3], %s159_s8  ;;  %s4224_s27 = scalar_lea.vmem %s5351_s23, 1024 }
  0x1b   : > { %v399_v11 = vsub.f32 %v4390_v4, %v4397_v6  ;;  %v406_v12 = vsub.f32 %v4393_v5, %v4401_v7  ;;  %v197_v13 = vsel %vm195_vm0, %v3507_v8, 0  ;;  %3814 = vmatprep.subr.mxu0 %v4390_v4  ;;  %v200_v14 = vsel %vm195_vm0, %v3508_v9, 0  ;;  %v3510_v15 = vld [vmem:[%s4406_s3 + $0x58] sm:$0xff]  ;;  %v3511_v16 = vld [vmem:[%s4406_s3 + $0x60] sm:$0xff]  ;;  %v3512_v17 = vld [vmem:[%s4406_s3 + $0x68] sm:$0xff]  ;;  %p4225_p12 = scmp.ne.s32.totalorder %s5351_s23, %s4224_s27  ;;  %s4303_s28 = smov [#allocation2]  }
  0x1c   : > { %v4422_v18 = vand.u32 4294901760, %v197_v13  ;;  %v4424_v19 = vand.u32 4294901760, %v200_v14  ;;  %v203_v20 = vsel %vm195_vm0, %v3509_v10, 0  ;;  %v206_v21 = vsel %vm195_vm0, %v3510_v15, 0  ;;  %v3513_v26 = vld [vmem:[%s4406_s3 + $0x70] sm:$0xff]  ;;  %v3514_v27 = vld [vmem:[%s4406_s3 + $0x78] sm:$0xff] }
  0x1d   : > { %v4428_v22 = vand.u32 4294901760, %v399_v11  ;;  %v4430_v23 = vand.u32 4294901760, %v406_v12  ;;  %v4432_v24 = vand.u32 4294901760, %v203_v20  ;;  %v4434_v25 = vand.u32 4294901760, %v206_v21  ;;  %v3525_v15 = vld [vmem:[%s4406_s3 + $0xc0] sm:$0xff]  ;;  %p4226_p13 = pnand %p4225_p12, %p4361_p4  ;;  %s4228_s29 = sshll.u32 %s4303_s28, 4  ;;  %s4229_s29 = int_to_ptr.vmem [resolvable:$false] %s4228_s29 }
  0x1e   : > { %v4439_v28 = vsub.f32 %v197_v13, %v4422_v18  ;;  %3802 = vmatprep.mubr.f32.mxu1 %v4422_v18  ;;  %v4443_v29 = vsub.f32 %v200_v14, %v4424_v19  ;;  %v209_v30 = vsel %vm195_vm0, %v3511_v16, 0  ;;  %v212_v31 = vsel %vm195_vm0, %v3512_v17, 0  ;;  %v181_v13 = vld [vmem:[%s5404_s0] sm:$0xff]  ;;  %v3526_v16 = vld [vmem:[%s4406_s3 + $0xc8] sm:$0xff]  ;;  %s4230_s30 = scalar_lea.vmem %s4229_s29, 2048  ;;  %p4231_p1 = scmp.lt.s32.totalorder %s5351_s23, %s4229_s29 }
  0x1f   : > { %3798 = vmatprep.subr.mxu1 %v4428_v22  ;;  %v4449_v32 = vsub.f32 %v203_v20, %v4432_v24  ;;  %v4452_v33 = vsub.f32 %v206_v21, %v4434_v25  ;;  %v4454_v34 = vand.u32 4294901760, %v209_v30  ;;  %v4456_v35 = vand.u32 4294901760, %v212_v31  ;;  %v3527_v21 = vld [vmem:[%s4406_s3 + $0xd0] sm:$0xff]  ;;  %p4227_p0 = pneg %p4226_p13  ;;  %p4232_p2 = scmp.lt.s32.totalorder %s4230_s30, %s4224_s27 }
  0x20   : > { %3799 = vmatpush3.msra.mxu1 %v4428_v22  ;;  %v289_v36 = vand.u32 4294901760, %v4439_v28  ;;  %v299_v37 = vand.u32 4294901760, %v4443_v29  ;;  %v215_v38 = vsel %vm195_vm0, %v3513_v26, 0  ;;  %v218_v39 = vsel %vm195_vm0, %v3514_v27, 0  ;;  %v3528_v26 = vld [vmem:[%s4406_s3 + $0xd8] sm:$0xff] }
  0x21   : > { %3800 = vmatprep.subr.mxu1 %v4430_v23  ;;  %v309_v40 = vand.u32 4294901760, %v4449_v32  ;;  %v319_v41 = vand.u32 4294901760, %v4452_v33  ;;  %v4467_v42 = vsub.f32 %v209_v30, %v4454_v34  ;;  %v4470_v43 = vsub.f32 %v212_v31, %v4456_v35  ;;  %v3529_v31 = vld [vmem:[%s4406_s3 + $0xe0] sm:$0xff]  ;;  %p4233_p3 = por %p4232_p2, %p4231_p1 }
  0x22   : > { %v290_v44 = vsub.f32 %v4439_v28, %v289_v36  ;;  %3801 = vmatpush3.msra.mxu1 %v4430_v23  ;;  %v300_v45 = vsub.f32 %v4443_v29, %v299_v37  ;;  %v4477_v46 = vand.u32 4294901760, %v215_v38  ;;  %v4479_v47 = vand.u32 4294901760, %v218_v39 }
  0x23   : > { %3803 = vmatmul.mubr.f32.vlgmr.msra.gmra.mxu1 %v4424_v19  ;;  %3830 = vmatprep.subr.mxu1 %v4383_v2  ;;  %v310_v48 = vsub.f32 %v4449_v32, %v309_v40  ;;  %v320_v49 = vsub.f32 %v4452_v33, %v319_v41  ;;  %v329_v50 = vand.u32 4294901760, %v4467_v42  ;;  %v339_v51 = vand.u32 4294901760, %v4470_v43  ;;  %p4234_p5 = pnand %p4233_p3, %p4227_p0 }
  0x24   : > { %v291_v53 = vand.u32 4294901760, %v290_v44  ;;  %v301_v54 = vand.u32 4294901760, %v300_v45  ;;  %3831 = vmatpush3.msra.mxu1 %v4383_v2  ;;  %3805 = vmatprep.mubr.f32.mxu1 %v4432_v24  ;;  %v4497_v55 = vsub.f32 %v215_v38, %v4477_v46  ;;  %v4500_v56 = vsub.f32 %v218_v39, %v4479_v47  ;;  %v3531_v44 = vld [vmem:[%s4406_s3 + $0xf0] sm:$0xff]  ;;  %v3532_v45 = vld [vmem:[%s4406_s3 + $0xf8] sm:$0xff] }
  0x25   : > { %v311_v57 = vand.u32 4294901760, %v310_v48  ;;  %v330_v58 = vsub.f32 %v4467_v42, %v329_v50  ;;  %3832 = vmatprep.subr.mxu1 %v4385_v3  ;;  %v321_v61 = vand.u32 4294901760, %v320_v49  ;;  %v340_v62 = vsub.f32 %v4470_v43, %v339_v51 }
  0x26   : > { %3786 = vmatprep.mubr.f32.mxu0 %v291_v53  ;;  %3833 = vmatpush3.msra.mxu1 %v4385_v3  ;;  %v349_v59 = vand.u32 4294901760, %v4497_v55  ;;  %v359_v63 = vand.u32 4294901760, %v4500_v56  ;;  %v4524_v8 = vsub.f32 %v182_v52, %v4508_v60  ;;  %v4541_v17 = vand.u32 4294901760, %v181_v13  ;;  %v3518_v52 = vld [vmem:[%s4406_s3 + $0x88] sm:$0xff] }
  0x27   : > { %3787 = vmatmul.mubr.f32.vlgmr.msra.gmra.mxu0 %v301_v54  ;;  %3806 = vmatmul.mubr.f32.gmra.mxu1 %v4434_v25  ;;  %v331_v0 = vand.u32 4294901760, %v330_v58  ;;  %v341_v9 = vand.u32 4294901760, %v340_v62  ;;  %v4550_v27 = vsel %vm195_vm0, %v3525_v15, 0  ;;  %v4553_v30 = vsel %vm195_vm0, %v3526_v16, 0  ;;  %v3520_v58 = vld [vmem:[%s4406_s3 + $0x98] sm:$0xff] }
  0x28   : > { %3815 = vmatpush3.msra.mxu0 %v4390_v4  ;;  %3789 = vmatprep.mubr.f32.mxu0 %v311_v57  ;;  %v350_v1 = vsub.f32 %v4497_v55, %v349_v59  ;;  %v360_v10 = vsub.f32 %v4500_v56, %v359_v63  ;;  %v4533_v12 = vand.u32 4294901760, %v4524_v8  ;;  %v4563_v38 = vsub.f32 %v181_v13, %v4541_v17  ;;  %v3519_v57 = vld [vmem:[%s4406_s3 + $0x90] sm:$0xff] }
  0x29   : > { %3808 = vmatprep.mubr.f32.mxu1 %v4454_v34  ;;  %3816 = vmatprep.subr.mxu0 %v4393_v5  ;;  %v4569_v39 = vsel %vm195_vm0, %v3528_v26, 0  ;;  %v4597_v49 = vsel %vm195_vm0, %v3532_v45, 0  ;;  %v3523_v13 = vld [vmem:[%s4406_s3 + $0xb0] sm:$0xff] }
  0x2a   : > { %3817 = vmatpush3.msra.mxu0 %v4393_v5  ;;  %3862 = vmatprep.subr.mxu1 %v4383_v2  ;;  %v351_v11 = vand.u32 4294901760, %v350_v1  ;;  %v361_v14 = vand.u32 4294901760, %v360_v10  ;;  %v1183_v20 = vsub.f32 %v4524_v8, %v4533_v12  ;;  %v4636_v1 = vsel %vm195_vm0, %v3520_v58, 0  ;;  %v3522_v10 = vld [vmem:[%s4406_s3 + $0xa8] sm:$0xff]  ;;  %v179_v45 = vld [vmem:[%s4406_s3 + $0x30] sm:$0xff] }
  0x2b   : > { %3790 = vmatmul.mubr.f32.gmra.mxu0 %v321_v61  ;;  %3809 = vmatmul.mubr.f32.gmra.mxu1 %v4456_v35 }
  0x2c   : > { %3792 = vmatprep.mubr.f32.mxu0 %v331_v0  ;;  %3811 = vmatprep.mubr.f32.mxu1 %v4477_v46  ;;  %v4633_v0 = vsel %vm195_vm0, %v3519_v57, 0  ;;  %v999_v57 = vsel %vm195_vm0, %v179_v45, 0 }
  0x2d   : > { %3846 = vmatprep.subr.mxu0 %v4397_v6 }
  0x2f   : > { %3793 = vmatmul.mubr.f32.gmra.mxu0 %v341_v9  ;;  %3812 = vmatmul.mubr.f32.gmra.mxu1 %v4479_v47  ;;  %v3521_v9 = vld [vmem:[%s4406_s3 + $0xa0] sm:$0xff] }
  0x30   : > { %3795 = vmatprep.mubr.f32.mxu0 %v351_v11  ;;  %3834 = vmatprep.mubr.f32.mxu1 %v289_v36  ;;  %v3530_v36 = vld [vmem:[%s4406_s3 + $0xe8] sm:$0xff]  ;;  %v176_v11 = vld [vmem:[%s4406_s3 + $0x18] sm:$0xff]  ;;  %v4652_v16 = vsel %vm195_vm0, %v3521_v9, 0 }
  0x31   : > { %v4583_v48 = vsel %vm195_vm0, %v3530_v36, 0  ;;  %v178_v36 = vld [vmem:[%s4406_s3 + $0x28] sm:$0xff] }
  0x33   : > { %3796 = vmatmul.mubr.f32.gmra.mxu0 %v361_v14  ;;  %3835 = vmatmul.mubr.f32.vlgmr.msra.gmra.mxu1 %v299_v37  ;;  %v4566_v37 = vsel %vm195_vm0, %v3527_v21, 0  ;;  %v3524_v14 = vld [vmem:[%s4406_s3 + $0xb8] sm:$0xff] }
  0x34   : > { %3818 = vmatprep.mubr.f32.mxu0 %v4439_v28  ;;  %3863 = vmatpush3.msra.mxu1 %v4383_v2  ;;  %v4572_v28 = vand.u32 4294901760, %v1183_v20  ;;  %v4655_v20 = vsel %vm195_vm0, %v3522_v10, 0 }
  0x35   : > { %3837 = vmatprep.mubr.f32.mxu1 %v309_v40  ;;  %3864 = vmatprep.subr.mxu1 %v4385_v3  ;;  %v4580_v40 = vsel %vm195_vm0, %v3529_v31, 0 }
  0x36   : > { %3865 = vmatpush3.msra.mxu1 %v4385_v3 }
  0x37   : > { %3819 = vmatmul.mubr.f32.vlgmr.msra.gmra.mxu0 %v4443_v29  ;;  %3838 = vmatmul.mubr.f32.gmra.mxu1 %v319_v41  ;;  %v4591_v29 = vand.u32 4294901760, %v4563_v38  ;;  %v4594_v41 = vsel %vm195_vm0, %v3531_v44, 0  ;;  %v4670_v44 = vsel %vm195_vm0, %v3523_v13, 0 }
  0x38   : > { %3847 = vmatpush3.msra.mxu0 %v4397_v6  ;;  %3821 = vmatprep.mubr.f32.mxu0 %v4449_v32  ;;  %v173_v32 = vld [vmem:[%s4406_s3] sm:$0xff] }
  0x39   : > { %3840 = vmatprep.mubr.f32.mxu1 %v329_v50  ;;  %3848 = vmatprep.subr.mxu0 %v4401_v7  ;;  %v3517_v50 = vld [vmem:[%s4406_s3 + $0x80] sm:$0xff]  ;;  %v1190_v53 = vsub.f32 %v4563_v38, %v4591_v29  ;;  %v981_v54 = vsel %vm195_vm0, %v173_v32, 0 }
  0x3a   : > { %3849 = vmatpush3.msra.mxu0 %v4401_v7  ;;  %3894 = vmatprep.subr.mxu1 %v4572_v28  ;;  %v4629_v61 = vand.u32 4294901760, %v981_v54 }
  0x3b   : > { %3822 = vmatmul.mubr.f32.gmra.mxu0 %v4452_v33  ;;  %3841 = vmatmul.mubr.f32.gmra.mxu1 %v339_v51  ;;  %v174_v33 = vld [vmem:[%s4406_s3 + $0x8] sm:$0xff]  ;;  %v175_v51 = vld [vmem:[%s4406_s3 + $0x10] sm:$0xff] }
  0x3c   : > { %3824 = vmatprep.mubr.f32.mxu0 %v4467_v42  ;;  %3843 = vmatprep.mubr.f32.mxu1 %v349_v59  ;;  %v4619_v42 = vsel %vm195_vm0, %v3517_v50, 0  ;;  %v4622_v59 = vsel %vm195_vm0, %v3518_v52, 0  ;;  %v984_v62 = vsel %vm195_vm0, %v174_v33, 0  ;;  %v4660_v21 = vsub.f32 %v981_v54, %v4629_v61  ;;  %v180_v33 = vld [vmem:[%s4406_s3 + $0x38] sm:$0xff] }
  0x3d   : > { %3878 = vmatprep.subr.mxu0 %v4508_v60  ;;  %v4649_v15 = vand.u32 4294901760, %v984_v62 }
  0x3e   : > { %v1073_v52 = vand.u32 4294901760, %v4660_v21 }
  0x3f   : > { %3825 = vmatmul.mubr.f32.gmra.mxu0 %v4470_v43  ;;  %3844 = vmatmul.mubr.f32.gmra.mxu1 %v359_v63  ;;  %v4640_v43 = vand.u32 4294901760, %v1190_v53  ;;  %v987_v63 = vsel %vm195_vm0, %v175_v51, 0  ;;  %v4680_v32 = vsub.f32 %v984_v62, %v4649_v15  ;;  %v1002_v62 = vsel %vm195_vm0, %v180_v33, 0 }
  0x40   : > { %3827 = vmatprep.mubr.f32.mxu0 %v4497_v55  ;;  %3866 = vmatprep.mubr.f32.mxu1 %v4422_v18  ;;  %v177_v55 = vld [vmem:[%s4406_s3 + $0x20] sm:$0xff]  ;;  %v4662_v26 = vand.u32 4294901760, %v987_v63  ;;  %v1074_v9 = vsub.f32 %v4660_v21, %v1073_v52  ;;  %v4729_v13 = vand.u32 4294901760, %v1002_v62 }
  0x41   : > { %v993_v31 = vsel %vm195_vm0, %v177_v55, 0 }
  0x42   : > { %v4688_v53 = vsub.f32 %v987_v63, %v4662_v26  ;;  %v4690_v54 = vand.u32 4294901760, %v993_v31  ;;  %v4717_v63 = vand.u32 4294901760, %v999_v57 }
  0x43   : > { %3828 = vmatmul.mubr.f32.gmra.mxu0 %v4500_v56  ;;  %3867 = vmatmul.mubr.f32.vlgmr.msra.gmra.mxu1 %v4424_v19  ;;  %v990_v56 = vsel %vm195_vm0, %v176_v11, 0 }
  0x44   : > { %3850 = vmatprep.mubr.f32.mxu0 %v4422_v18  ;;  %3895 = vmatpush3.msra.mxu1 %v4572_v28  ;;  %v4673_v18 = vsel %vm195_vm0, %v3524_v14, 0  ;;  %v4682_v50 = vand.u32 4294901760, %v990_v56  ;;  %v4715_v10 = vsub.f32 %v993_v31, %v4690_v54  ;;  %v1075_v14 = vand.u32 4294901760, %v1074_v9 }
  0x45   : > { %3869 = vmatprep.mubr.f32.mxu1 %v4432_v24  ;;  %3896 = vmatprep.subr.mxu1 %v4640_v43  ;;  %v1132_v31 = vsub.f32 %v999_v57, %v4717_v63 }
  0x46   : > { %3897 = vmatpush3.msra.mxu1 %v4640_v43  ;;  %v4703_v58 = vsub.f32 %v990_v56, %v4682_v50  ;;  %v1113_v56 = vand.u32 4294901760, %v4715_v10 }
  0x47   : > { %3851 = vmatmul.mubr.f32.vlgmr.msra.gmra.mxu0 %v4424_v19  ;;  %3870 = vmatmul.mubr.f32.gmra.mxu1 %v4434_v25  ;;  %v996_v19 = vsel %vm195_vm0, %v178_v36, 0 }
  0x48   : > { %3879 = vmatpush3.msra.mxu0 %v4508_v60  ;;  %3853 = vmatprep.mubr.f32.mxu0 %v4432_v24  ;;  %v5407_v24 = vand.u32 4294901760, %v4680_v32  ;;  %v4705_v51 = vand.u32 4294901760, %v996_v19  ;;  %v1103_v11 = vand.u32 4294901760, %v4703_v58  ;;  %v1114_v9 = vsub.f32 %v4715_v10, %v1113_v56 }
  0x49   : > { %3872 = vmatprep.mubr.f32.mxu1 %v4454_v34  ;;  %3880 = vmatprep.subr.mxu0 %v4541_v17 }
  0x4a   : > { %3881 = vmatpush3.msra.mxu0 %v4541_v17  ;;  %3926 = vmatprep.subr.mxu1 %v4508_v60  ;;  %v4727_v55 = vsub.f32 %v996_v19, %v4705_v51  ;;  %v1104_v45 = vsub.f32 %v4703_v58, %v1103_v11 }
  0x4b   : > { %3854 = vmatmul.mubr.f32.gmra.mxu0 %v4434_v25  ;;  %3873 = vmatmul.mubr.f32.gmra.mxu1 %v4456_v35  ;;  %v1093_v25 = vand.u32 4294901760, %v4688_v53 }
  0x4c   : > { %3856 = vmatprep.mubr.f32.mxu0 %v4454_v34  ;;  %3875 = vmatprep.mubr.f32.mxu1 %v4477_v46  ;;  %v1084_v34 = vsub.f32 %v4680_v32, %v5407_v24  ;;  %v1123_v19 = vand.u32 4294901760, %v4727_v55  ;;  %v1133_v24 = vand.u32 4294901760, %v1132_v31 }
  0x4d   : > { %3910 = vmatprep.subr.mxu0 %v4524_v8 }
  0x4e   : > { %v1085_v36 = vand.u32 4294901760, %v1084_v34  ;;  %v1124_v57 = vsub.f32 %v4727_v55, %v1123_v19  ;;  %v1115_v34 = vand.u32 4294901760, %v1114_v9  ;;  %v5410_v9 = vand.u32 4294901760, %v4680_v32 }
  0x4f   : > { %3857 = vmatmul.mubr.f32.gmra.mxu0 %v4456_v35  ;;  %3876 = vmatmul.mubr.f32.gmra.mxu1 %v4479_v47  ;;  %v1094_v35 = vsub.f32 %v4688_v53, %v1093_v25 }
  0x50   : > { %3859 = vmatprep.mubr.f32.mxu0 %v4477_v46  ;;  %3898 = vmatprep.mubr.f32.mxu1 %v4629_v61  ;;  %v1142_v46 = vsub.f32 %v1002_v62, %v4729_v13 }
  0x51   : > { %v1095_v33 = vand.u32 4294901760, %v1094_v35  ;;  %v1125_v35 = vand.u32 4294901760, %v1124_v57 }
  0x52   : > { %v1143_v62 = vand.u32 4294901760, %v1142_v46 }
  0x53   : > { %3860 = vmatmul.mubr.f32.gmra.mxu0 %v4479_v47  ;;  %3899 = vmatmul.mubr.f32.vlgmr.msra.gmra.mxu1 %v4649_v15  ;;  %v1105_v47 = vand.u32 4294901760, %v1104_v45 }
  0x54   : > { %3882 = vmatprep.mubr.f32.mxu0 %v1075_v14  ;;  %3927 = vmatpush3.msra.mxu1 %v4508_v60  ;;  %v1134_v14 = vsub.f32 %v1132_v31, %v1133_v24 }
  0x55   : > { %3901 = vmatprep.mubr.f32.mxu1 %v4662_v26  ;;  %3928 = vmatprep.subr.mxu1 %v4541_v17 }
  0x56   : > { %3929 = vmatpush3.msra.mxu1 %v4541_v17  ;;  %v1135_v45 = vand.u32 4294901760, %v1134_v14 }
  0x57   : > { %3883 = vmatmul.mubr.f32.vlgmr.msra.gmra.mxu0 %v1085_v36  ;;  %3902 = vmatmul.mubr.f32.gmra.mxu1 %v4682_v50  ;;  %v1144_v36 = vsub.f32 %v1142_v46, %v1143_v62 }
  0x58   : > { %3911 = vmatpush3.msra.mxu0 %v4524_v8  ;;  %3885 = vmatprep.mubr.f32.mxu0 %v1095_v33 }
  0x59   : > { %3904 = vmatprep.mubr.f32.mxu1 %v4690_v54  ;;  %3912 = vmatprep.subr.mxu0 %v4563_v38  ;;  %v1145_v33 = vand.u32 4294901760, %v1144_v36 }
  0x5a   : > { %3913 = vmatpush3.msra.mxu0 %v4563_v38  ;;  %3958 = vmatprep.subr.mxu1 %v4508_v60 }
  0x5b   : > { %3886 = vmatmul.mubr.f32.gmra.mxu0 %v1105_v47  ;;  %3905 = vmatmul.mubr.f32.gmra.mxu1 %v4705_v51 }
  0x5c   : > { %3888 = vmatprep.mubr.f32.mxu0 %v1115_v34  ;;  %3907 = vmatprep.mubr.f32.mxu1 %v4717_v63 }
  0x5d   : > { %3942 = vmatprep.subr.mxu0 %v4533_v12 }
  0x5f   : > { %3889 = vmatmul.mubr.f32.gmra.mxu0 %v1125_v35  ;;  %3908 = vmatmul.mubr.f32.gmra.mxu1 %v4729_v13 }
  0x60   : > { %3891 = vmatprep.mubr.f32.mxu0 %v1135_v45  ;;  %3930 = vmatprep.mubr.f32.mxu1 %v1073_v52  ;;  %v4934_v45 = vand.u32 4294901760, %v4652_v16 }
  0x63   : > { %3892 = vmatmul.mubr.f32.gmra.mxu0 %v1145_v33  ;;  %3931 = vmatmul.mubr.f32.vlgmr.msra.gmra.mxu1 %v5410_v9  ;;  %v4948_v33 = vand.u32 4294901760, %v4655_v20 }
  0x64   : > { %3914 = vmatprep.mubr.f32.mxu0 %v4660_v21  ;;  %3959 = vmatpush3.msra.mxu1 %v4508_v60  ;;  %v4777_v21 = vand.u32 4294901760, %v4550_v27 }
  0x65   : > { %3933 = vmatprep.mubr.f32.mxu1 %v1093_v25  ;;  %3960 = vmatprep.subr.mxu1 %v4541_v17 }
  0x66   : > { %3961 = vmatpush3.msra.mxu1 %v4541_v17  ;;  %v4787_v52 = vsub.f32 %v4550_v27, %v4777_v21  ;;  %v4802_v27 = vand.u32 4294901760, %v4569_v39 }
  0x67   : > { %3915 = vmatmul.mubr.f32.vlgmr.msra.gmra.mxu0 %v4680_v32  ;;  %3934 = vmatmul.mubr.f32.gmra.mxu1 %v1103_v11  ;;  %v4781_v32 = vand.u32 4294901760, %v4553_v30 }
  0x68   : > { %3943 = vmatpush3.msra.mxu0 %v4533_v12  ;;  %3917 = vmatprep.mubr.f32.mxu0 %v4688_v53  ;;  %v4790_v53 = vand.u32 4294901760, %v4566_v37 }
  0x69   : > { %3936 = vmatprep.mubr.f32.mxu1 %v1113_v56  ;;  %3944 = vmatprep.subr.mxu0 %v4591_v29 }
  0x6a   : > { %3945 = vmatpush3.msra.mxu0 %v4591_v29  ;;  %3990 = vmatprep.subr.mxu1 %v4428_v22 }
  0x6b   : > { %3918 = vmatmul.mubr.f32.gmra.mxu0 %v4703_v58  ;;  %3937 = vmatmul.mubr.f32.gmra.mxu1 %v1123_v19 }
  0x6c   : > { %3920 = vmatprep.mubr.f32.mxu0 %v4715_v10  ;;  %3939 = vmatprep.mubr.f32.mxu1 %v1133_v24 }
  0x6d   : > { %3974 = vmatprep.subr.mxu0 %v4383_v2 }
  0x6f   : > { %3921 = vmatmul.mubr.f32.gmra.mxu0 %v4727_v55  ;;  %3940 = vmatmul.mubr.f32.gmra.mxu1 %v1143_v62 }
  0x70   : > { %3923 = vmatprep.mubr.f32.mxu0 %v1132_v31  ;;  %3962 = vmatprep.mubr.f32.mxu1 %v4629_v61 }
  0x73   : > { %3924 = vmatmul.mubr.f32.gmra.mxu0 %v1142_v46  ;;  %3963 = vmatmul.mubr.f32.vlgmr.msra.gmra.mxu1 %v4649_v15 }
  0x74   : > { %3946 = vmatprep.mubr.f32.mxu0 %v4629_v61  ;;  %3991 = vmatpush3.msra.mxu1 %v4428_v22  ;;  %v4799_v22 = vsub.f32 %v4553_v30, %v4781_v32  ;;  %v1888_v61 = vand.u32 4294901760, %v4787_v52 }
  0x75   : > { %3965 = vmatprep.mubr.f32.mxu1 %v4662_v26  ;;  %3992 = vmatprep.subr.mxu1 %v4430_v23 }
  0x76   : > { %3993 = vmatpush3.msra.mxu1 %v4430_v23  ;;  %v4809_v23 = vsub.f32 %v4566_v37, %v4790_v53  ;;  %v1898_v30 = vand.u32 4294901760, %v4799_v22  ;;  %v4823_v37 = vsub.f32 %v4569_v39, %v4802_v27  ;;  %v1889_v24 = vsub.f32 %v4787_v52, %v1888_v61 }
  0x77   : > { %3947 = vmatmul.mubr.f32.vlgmr.msra.gmra.mxu0 %v4649_v15  ;;  %3966 = vmatmul.mubr.f32.gmra.mxu1 %v4682_v50  ;;  %v4812_v15 = vand.u32 4294901760, %v4580_v40  ;;  %v4839_v39 = vand.u32 4294901760, %v4594_v41 }
  0x78   : > { %3975 = vmatpush3.msra.mxu0 %v4383_v2  ;;  %3949 = vmatprep.mubr.f32.mxu0 %v4662_v26  ;;  %v4826_v26 = vand.u32 4294901760, %v4583_v48  ;;  %v1918_v25 = vand.u32 4294901760, %v4823_v37  ;;  %v1890_v11 = vand.u32 4294901760, %v1889_v24 }
  0x79   : > { %3968 = vmatprep.mubr.f32.mxu1 %v4690_v54  ;;  %3976 = vmatprep.subr.mxu0 %v4385_v3  ;;  %v4836_v58 = vsub.f32 %v4580_v40, %v4812_v15  ;;  %v4851_v40 = vand.u32 4294901760, %v4597_v49  ;;  %v1947_v56 = vsub.f32 %v4594_v41, %v4839_v39 }
  0x7a   : > { %3977 = vmatpush3.msra.mxu0 %v4385_v3  ;;  %4022 = vmatprep.subr.mxu1 %v4383_v2  ;;  %v4848_v10 = vsub.f32 %v4583_v48, %v4826_v26  ;;  %v1919_v48 = vsub.f32 %v4823_v37, %v1918_v25 }
  0x7b   : > { %3950 = vmatmul.mubr.f32.gmra.mxu0 %v4682_v50  ;;  %3969 = vmatmul.mubr.f32.gmra.mxu1 %v4705_v51  ;;  %v1908_v50 = vand.u32 4294901760, %v4809_v23  ;;  %v1928_v55 = vand.u32 4294901760, %v4836_v58  ;;  %v1948_v57 = vand.u32 4294901760, %v1947_v56 }
  0x7c   : > { %3952 = vmatprep.mubr.f32.mxu0 %v4690_v54  ;;  %3971 = vmatprep.mubr.f32.mxu1 %v4717_v63  ;;  %v1899_v54 = vsub.f32 %v4799_v22, %v1898_v30  ;;  %v1938_v19 = vand.u32 4294901760, %v4848_v10  ;;  %v1920_v41 = vand.u32 4294901760, %v1919_v48 }
  0x7d   : > { %4006 = vmatprep.subr.mxu0 %v4390_v4  ;;  %v1929_v47 = vsub.f32 %v4836_v58, %v1928_v55  ;;  %v1949_v34 = vsub.f32 %v1947_v56, %v1948_v57 }
  0x7e   : > { %v1900_v31 = vand.u32 4294901760, %v1899_v54 }
  0x7f   : > { %3953 = vmatmul.mubr.f32.gmra.mxu0 %v4705_v51  ;;  %3972 = vmatmul.mubr.f32.gmra.mxu1 %v4729_v13  ;;  %v1909_v51 = vsub.f32 %v4809_v23, %v1908_v50  ;;  %v1930_v62 = vand.u32 4294901760, %v1929_v47  ;;  %v1950_v36 = vand.u32 4294901760, %v1949_v34 }
  0x80   : > { %3955 = vmatprep.mubr.f32.mxu0 %v4717_v63  ;;  %3994 = vmatprep.mubr.f32.mxu1 %v4777_v21  ;;  %v1957_v63 = vsub.f32 %v4597_v49, %v4851_v40 }
  0x81   : > { %v1910_v46 = vand.u32 4294901760, %v1909_v51 }
  0x82   : > { %v1958_v49 = vand.u32 4294901760, %v1957_v63 }
  0x83   : > { %3956 = vmatmul.mubr.f32.gmra.mxu0 %v4729_v13  ;;  %3995 = vmatmul.mubr.f32.vlgmr.msra.gmra.mxu1 %v4781_v32  ;;  %v1939_v13 = vsub.f32 %v4848_v10, %v1938_v19 }
  0x84   : > { %3978 = vmatprep.mubr.f32.mxu0 %v1890_v11  ;;  %4023 = vmatpush3.msra.mxu1 %v4383_v2  ;;  %v1959_v35 = vsub.f32 %v1957_v63, %v1958_v49 }
  0x85   : > { %3997 = vmatprep.mubr.f32.mxu1 %v4790_v53  ;;  %4024 = vmatprep.subr.mxu1 %v4385_v3  ;;  %v1940_v14 = vand.u32 4294901760, %v1939_v13 }
  0x86   : > { %4025 = vmatpush3.msra.mxu1 %v4385_v3 }
  0x87   : > { %3979 = vmatmul.mubr.f32.vlgmr.msra.gmra.mxu0 %v1900_v31  ;;  %3998 = vmatmul.mubr.f32.gmra.mxu1 %v4802_v27 }
  0x88   : > { %4007 = vmatpush3.msra.mxu0 %v4390_v4  ;;  %3981 = vmatprep.mubr.f32.mxu0 %v1910_v46  ;;  %v1960_v4 = vand.u32 4294901760, %v1959_v35 }
  0x89   : > { %4000 = vmatprep.mubr.f32.mxu1 %v4812_v15  ;;  %4008 = vmatprep.subr.mxu0 %v4393_v5 }
  0x8a   : > { %4009 = vmatpush3.msra.mxu0 %v4393_v5  ;;  %4054 = vmatprep.subr.mxu1 %v4383_v2 }
  0x8b   : > { %3982 = vmatmul.mubr.f32.gmra.mxu0 %v1920_v41  ;;  %4001 = vmatmul.mubr.f32.gmra.mxu1 %v4826_v26 }
  0x8c   : > { %3984 = vmatprep.mubr.f32.mxu0 %v1930_v62  ;;  %4003 = vmatprep.mubr.f32.mxu1 %v4839_v39 }
  0x8d   : > { %4038 = vmatprep.subr.mxu0 %v4397_v6 }
  0x8f   : > { %3985 = vmatmul.mubr.f32.gmra.mxu0 %v1940_v14  ;;  %4004 = vmatmul.mubr.f32.gmra.mxu1 %v4851_v40 }
  0x90   : > { %3987 = vmatprep.mubr.f32.mxu0 %v1950_v36  ;;  %4026 = vmatprep.mubr.f32.mxu1 %v1888_v61 }
  0x93   : > { %3988 = vmatmul.mubr.f32.gmra.mxu0 %v1960_v4  ;;  %4027 = vmatmul.mubr.f32.vlgmr.msra.gmra.mxu1 %v1898_v30 }
  0x94   : > { %4010 = vmatprep.mubr.f32.mxu0 %v4787_v52  ;;  %4055 = vmatpush3.msra.mxu1 %v4383_v2  ;;  %v4899_v2 = vand.u32 4294901760, %v4619_v42 }
  0x95   : > { %4029 = vmatprep.mubr.f32.mxu1 %v1908_v50  ;;  %4056 = vmatprep.subr.mxu1 %v4385_v3 }
  0x96   : > { %4057 = vmatpush3.msra.mxu1 %v4385_v3  ;;  %v4903_v3 = vand.u32 4294901760, %v4622_v59  ;;  %v4909_v5 = vsub.f32 %v4619_v42, %v4899_v2 }
  0x97   : > { %4011 = vmatmul.mubr.f32.vlgmr.msra.gmra.mxu0 %v4799_v22  ;;  %4030 = vmatmul.mubr.f32.gmra.mxu1 %v1918_v25  ;;  %v4970_v22 = vsub.f32 %v4655_v20, %v4948_v33 }
  0x98   : > { %4039 = vmatpush3.msra.mxu0 %v4397_v6  ;;  %4013 = vmatprep.mubr.f32.mxu0 %v4809_v23  ;;  %v4912_v6 = vand.u32 4294901760, %v4633_v0  ;;  %v2672_v42 = vand.u32 4294901760, %v4909_v5 }
  0x99   : > { %4032 = vmatprep.mubr.f32.mxu1 %v1928_v55  ;;  %4040 = vmatprep.subr.mxu0 %v4401_v7 }
  0x9a   : > { %4041 = vmatpush3.msra.mxu0 %v4401_v7  ;;  %4086 = vmatprep.subr.mxu1 %v4572_v28  ;;  %v4921_v7 = vsub.f32 %v4622_v59, %v4903_v3  ;;  %v2673_v9 = vsub.f32 %v4909_v5, %v2672_v42 }
  0x9b   : > { %4014 = vmatmul.mubr.f32.gmra.mxu0 %v4823_v37  ;;  %4033 = vmatmul.mubr.f32.gmra.mxu1 %v1938_v19  ;;  %v2722_v37 = vand.u32 4294901760, %v4970_v22 }
  0x9c   : > { %4016 = vmatprep.mubr.f32.mxu0 %v4836_v58  ;;  %4035 = vmatprep.mubr.f32.mxu1 %v1948_v57  ;;  %v2682_v59 = vand.u32 4294901760, %v4921_v7 }
  0x9d   : > { %4070 = vmatprep.subr.mxu0 %v4508_v60 }
  0x9e   : > { %v2683_v52 = vsub.f32 %v4921_v7, %v2682_v59 }
  0x9f   : > { %4017 = vmatmul.mubr.f32.gmra.mxu0 %v4848_v10  ;;  %4036 = vmatmul.mubr.f32.gmra.mxu1 %v1958_v49 }
  0xa0   : > { %4019 = vmatprep.mubr.f32.mxu0 %v1947_v56  ;;  %4058 = vmatprep.mubr.f32.mxu1 %v4777_v21  ;;  %v2684_v30 = vand.u32 4294901760, %v2683_v52 }
  0xa3   : > { %4020 = vmatmul.mubr.f32.gmra.mxu0 %v1957_v63  ;;  %4059 = vmatmul.mubr.f32.vlgmr.msra.gmra.mxu1 %v4781_v32 }
  0xa4   : > { %4042 = vmatprep.mubr.f32.mxu0 %v4777_v21  ;;  %4087 = vmatpush3.msra.mxu1 %v4572_v28  ;;  %v4924_v28 = vand.u32 4294901760, %v4636_v1 }
  0xa5   : > { %4061 = vmatprep.mubr.f32.mxu1 %v4790_v53  ;;  %4088 = vmatprep.subr.mxu1 %v4640_v43 }
  0xa6   : > { %4089 = vmatpush3.msra.mxu1 %v4640_v43  ;;  %v4931_v43 = vsub.f32 %v4633_v0, %v4912_v6  ;;  %v4945_v0 = vsub.f32 %v4636_v1, %v4924_v28  ;;  %v4961_v1 = vand.u32 4294901760, %v4670_v44 }
  0xa7   : > { %4043 = vmatmul.mubr.f32.vlgmr.msra.gmra.mxu0 %v4781_v32  ;;  %4062 = vmatmul.mubr.f32.gmra.mxu1 %v4802_v27  ;;  %v4958_v32 = vsub.f32 %v4652_v16, %v4934_v45  ;;  %v4973_v16 = vand.u32 4294901760, %v4673_v18 }
  0xa8   : > { %4071 = vmatpush3.msra.mxu0 %v4508_v60  ;;  %4045 = vmatprep.mubr.f32.mxu0 %v4790_v53  ;;  %v2692_v21 = vand.u32 4294901760, %v4931_v43  ;;  %v2702_v53 = vand.u32 4294901760, %v4945_v0 }
  0xa9   : > { %4064 = vmatprep.mubr.f32.mxu1 %v4812_v15  ;;  %4072 = vmatprep.subr.mxu0 %v4541_v17  ;;  %v2712_v23 = vand.u32 4294901760, %v4958_v32 }
  0xaa   : > { %4073 = vmatpush3.msra.mxu0 %v4541_v17  ;;  %4118 = vmatprep.subr.mxu1 %v4508_v60  ;;  %v2693_v61 = vsub.f32 %v4931_v43, %v2692_v21  ;;  %v2703_v20 = vsub.f32 %v4945_v0, %v2702_v53 }
  0xab   : > { %4046 = vmatmul.mubr.f32.gmra.mxu0 %v4802_v27  ;;  %4065 = vmatmul.mubr.f32.gmra.mxu1 %v4826_v26  ;;  %v2674_v27 = vand.u32 4294901760, %v2673_v9  ;;  %v2713_v50 = vsub.f32 %v4958_v32, %v2712_v23 }
  0xac   : > { %4048 = vmatprep.mubr.f32.mxu0 %v4812_v15  ;;  %4067 = vmatprep.mubr.f32.mxu1 %v4839_v39  ;;  %v2731_v15 = vsub.f32 %v4670_v44, %v4961_v1  ;;  %v2694_v24 = vand.u32 4294901760, %v2693_v61  ;;  %v2704_v44 = vand.u32 4294901760, %v2703_v20 }
  0xad   : > { %4102 = vmatprep.subr.mxu0 %v4524_v8  ;;  %v2714_v54 = vand.u32 4294901760, %v2713_v50 }
  0xae   : > { %v2732_v58 = vand.u32 4294901760, %v2731_v15 }
  0xaf   : > { %4049 = vmatmul.mubr.f32.gmra.mxu0 %v4826_v26  ;;  %4068 = vmatmul.mubr.f32.gmra.mxu1 %v4851_v40  ;;  %v2741_v26 = vsub.f32 %v4673_v18, %v4973_v16 }
  0xb0   : > { %4051 = vmatprep.mubr.f32.mxu0 %v4839_v39  ;;  %4090 = vmatprep.mubr.f32.mxu1 %v4899_v2  ;;  %v2723_v39 = vsub.f32 %v4970_v22, %v2722_v37  ;;  %v2733_v25 = vsub.f32 %v2731_v15, %v2732_v58 }
  0xb1   : > { %v2742_v18 = vand.u32 4294901760, %v2741_v26 }
  0xb2   : > { %v2724_v10 = vand.u32 4294901760, %v2723_v39  ;;  %v2734_v11 = vand.u32 4294901760, %v2733_v25 }
  0xb3   : > { %4052 = vmatmul.mubr.f32.gmra.mxu0 %v4851_v40  ;;  %4091 = vmatmul.mubr.f32.vlgmr.msra.gmra.mxu1 %v4903_v3  ;;  %v2743_v40 = vsub.f32 %v2741_v26, %v2742_v18 }
  0xb4   : > { %4074 = vmatprep.mubr.f32.mxu0 %v2674_v27  ;;  %4119 = vmatpush3.msra.mxu1 %v4508_v60 }
  0xb5   : > { %4093 = vmatprep.mubr.f32.mxu1 %v4912_v6  ;;  %4120 = vmatprep.subr.mxu1 %v4541_v17 }
  0xb6   : > { %4121 = vmatpush3.msra.mxu1 %v4541_v17 }
  0xb7   : > { %4075 = vmatmul.mubr.f32.vlgmr.msra.gmra.mxu0 %v2684_v30  ;;  %4094 = vmatmul.mubr.f32.gmra.mxu1 %v4924_v28 }
  0xb8   : > { %4103 = vmatpush3.msra.mxu0 %v4524_v8  ;;  %4077 = vmatprep.mubr.f32.mxu0 %v2694_v24  ;;  %v2744_v8 = vand.u32 4294901760, %v2743_v40 }
  0xb9   : > { %4096 = vmatprep.mubr.f32.mxu1 %v4934_v45  ;;  %4104 = vmatprep.subr.mxu0 %v4563_v38 }
  0xba   : > { %4105 = vmatpush3.msra.mxu0 %v4563_v38  ;;  %4150 = vmatprep.subr.mxu1 %v4508_v60 }
  0xbb   : > { %4078 = vmatmul.mubr.f32.gmra.mxu0 %v2704_v44  ;;  %4097 = vmatmul.mubr.f32.gmra.mxu1 %v4948_v33 }
  0xbc   : > { %4080 = vmatprep.mubr.f32.mxu0 %v2714_v54  ;;  %4099 = vmatprep.mubr.f32.mxu1 %v4961_v1 }
  0xbd   : > { %4134 = vmatprep.subr.mxu0 %v4533_v12 }
  0xbf   : > { %4081 = vmatmul.mubr.f32.gmra.mxu0 %v2724_v10  ;;  %4100 = vmatmul.mubr.f32.gmra.mxu1 %v4973_v16 }
  0xc0   : > { %4083 = vmatprep.mubr.f32.mxu0 %v2734_v11  ;;  %4122 = vmatprep.mubr.f32.mxu1 %v2672_v42 }
  0xc3   : > { %4084 = vmatmul.mubr.f32.gmra.mxu0 %v2744_v8  ;;  %4123 = vmatmul.mubr.f32.vlgmr.msra.gmra.mxu1 %v2682_v59 }
  0xc4   : > { %4106 = vmatprep.mubr.f32.mxu0 %v4909_v5  ;;  %4151 = vmatpush3.msra.mxu1 %v4508_v60 }
  0xc5   : > { %4125 = vmatprep.mubr.f32.mxu1 %v2692_v21  ;;  %4152 = vmatprep.subr.mxu1 %v4541_v17 }
  0xc6   : > { %4153 = vmatpush3.msra.mxu1 %v4541_v17 }
  0xc7   : > { %4107 = vmatmul.mubr.f32.vlgmr.msra.gmra.mxu0 %v4921_v7  ;;  %4126 = vmatmul.mubr.f32.gmra.mxu1 %v2702_v53 }
  0xc8   : > { %4135 = vmatpush3.msra.mxu0 %v4533_v12  ;;  %4109 = vmatprep.mubr.f32.mxu0 %v4931_v43 }
  0xc9   : > { %4128 = vmatprep.mubr.f32.mxu1 %v2712_v23  ;;  %4136 = vmatprep.subr.mxu0 %v4591_v29 }
  0xca   : > { %4137 = vmatpush3.msra.mxu0 %v4591_v29 }
  0xcb   : > { %4110 = vmatmul.mubr.f32.gmra.mxu0 %v4945_v0  ;;  %4129 = vmatmul.mubr.f32.gmra.mxu1 %v2722_v37 }
  0xcc   : > { %4112 = vmatprep.mubr.f32.mxu0 %v4958_v32  ;;  %4131 = vmatprep.mubr.f32.mxu1 %v2732_v58 }
  0xcf   : > { %4113 = vmatmul.mubr.f32.gmra.mxu0 %v4970_v22  ;;  %4132 = vmatmul.mubr.f32.gmra.mxu1 %v2742_v18 }
  0xd0   : > { %4115 = vmatprep.mubr.f32.mxu0 %v2731_v15  ;;  %4154 = vmatprep.mubr.f32.mxu1 %v4899_v2 }
  0xd3   : > { %4116 = vmatmul.mubr.f32.gmra.mxu0 %v2741_v26  ;;  %4155 = vmatmul.mubr.f32.vlgmr.msra.gmra.mxu1 %v4903_v3 }
  0xd4   : > { %4138 = vmatprep.mubr.f32.mxu0 %v4899_v2  ;;  %4157 = vmatprep.mubr.f32.mxu1 %v4912_v6 }
  0xd7   : > { %4139 = vmatmul.mubr.f32.vlgmr.msra.gmra.mxu0 %v4903_v3  ;;  %4158 = vmatmul.mubr.f32.gmra.mxu1 %v4924_v28 }
  0xd8   : > { %4141 = vmatprep.mubr.f32.mxu0 %v4912_v6  ;;  %4160 = vmatprep.mubr.f32.mxu1 %v4934_v45 }
  0xdb   : > { %4142 = vmatmul.mubr.f32.gmra.mxu0 %v4924_v28  ;;  %4161 = vmatmul.mubr.f32.gmra.mxu1 %v4948_v33 }
  0xdc   : > { %4144 = vmatprep.mubr.f32.mxu0 %v4934_v45  ;;  %4163 = vmatprep.mubr.f32.mxu1 %v4961_v1 }
  0xdf   : > { %4145 = vmatmul.mubr.f32.gmra.mxu0 %v4948_v33  ;;  %4164 = vmatmul.mubr.f32.gmra.mxu1 %v4973_v16 }
  0xe0   : > { %4147 = vmatprep.mubr.f32.mxu0 %v4961_v1 }
  0xe3   : > { %4148 = vmatmul.mubr.f32.gmra.mxu0 %v4973_v16  ;;  %v3804_v60 = vpop.f32.mrf.mxu1 }
  0xe5   : > { %v444_v12 = vpop.f32.mrf.mxu1 }
  0xe7   : > { %v3788_v17 = vpop.f32.mrf.mxu0  ;;  %v3807_v38 = vpop.f32.mrf.mxu1 }
  0xe8   : > { %v451_v54 = vadd.f32 %v3804_v60, %v3788_v17 }
  0xe9   : > { %v293_v29 = vpop.f32.mrf.mxu0  ;;  %v5033_v51 = vpop.f32.mrf.mxu1 }
  0xea   : > { %v445_v40 = vadd.f32 %v444_v12, %v293_v29 }
  0xeb   : > { %v3791_v55 = vpop.f32.mrf.mxu0  ;;  %v5035_v56 = vpop.f32.mrf.mxu1 }
  0xed   : > { %v313_v31 = vpop.f32.mrf.mxu0  ;;  %v5037_v48 = vpop.f32.mrf.mxu1 }
  0xef   : > { %v5039_v19 = vpop.f32.mrf.mxu0  ;;  %v5041_v63 = vpop.f32.mrf.mxu1 }
  0xf0   : > { %v475_v12 = vadd.f32 %v5035_v56, %v5039_v19 }
  0xf1   : > { %v5043_v46 = vpop.f32.mrf.mxu0  ;;  %v5045_v47 = vpop.f32.mrf.mxu1 }
  0xf3   : > { %v5047_v57 = vpop.f32.mrf.mxu0  ;;  %v3836_v41 = vpop.f32.mrf.mxu1 }
  0xf5   : > { %v5049_v13 = vpop.f32.mrf.mxu0  ;;  %v686_v49 = vpop.f32.mrf.mxu1 }
  0xf7   : > { %v3820_v62 = vpop.f32.mrf.mxu0  ;;  %v3839_v34 = vpop.f32.mrf.mxu1 }
  0xf8   : > { %v570_v11 = vadd.f32 %v3820_v62, %v451_v54 }
  0xf9   : > { %v562_v14 = vpop.f32.mrf.mxu0  ;;  %v5051_v35 = vpop.f32.mrf.mxu1 }
  0xfb   : > { %v3823_v36 = vpop.f32.mrf.mxu0  ;;  %v5053_v4 = vpop.f32.mrf.mxu1 }
  0xfd   : > { %v576_v2 = vpop.f32.mrf.mxu0  ;;  %v5055_v3 = vpop.f32.mrf.mxu1 }
  0xff   : > { %v3826_v5 = vpop.f32.mrf.mxu0  ;;  %v5057_v6 = vpop.f32.mrf.mxu1 }
 0x101   : > { %v590_v7 = vpop.f32.mrf.mxu0  ;;  %v5059_v28 = vpop.f32.mrf.mxu1 }
 0x103   : > { %v3829_v42 = vpop.f32.mrf.mxu0  ;;  %v3868_v43 = vpop.f32.mrf.mxu1 }
 0x105   : > { %v5061_v45 = vpop.f32.mrf.mxu0  ;;  %v5063_v59 = vpop.f32.mrf.mxu1 }
 0x107   : > { %v3852_v0 = vpop.f32.mrf.mxu0  ;;  %v5065_v33 = vpop.f32.mrf.mxu1 }
 0x109   : > { %v819_v9 = vpop.f32.mrf.mxu0  ;;  %v5067_v21 = vpop.f32.mrf.mxu1 }
 0x10b   : > { %v3855_v32 = vpop.f32.mrf.mxu0  ;;  %v5069_v1 = vpop.f32.mrf.mxu1 }
 0x10d   : > { %v831_v52 = vpop.f32.mrf.mxu0  ;;  %v5071_v53 = vpop.f32.mrf.mxu1 }
 0x10f   : > { %v3858_v22 = vpop.f32.mrf.mxu0  ;;  %v5073_v16 = vpop.f32.mrf.mxu1 }
 0x110   : > { %5411 = vst [vmem:[#allocation5_spill] sm:$0xff] %v5073_v16  ;;  %v463_v16 = vadd.f32 %v3807_v38, %v3791_v55  ;;  %v469_v38 = vadd.f32 %v5037_v48, %v5043_v46  ;;  %v481_v48 = vadd.f32 %v5045_v47, %v5049_v13 }
 0x111   : > { %v5075_v27 = vpop.f32.mrf.mxu0  ;;  %v5077_v61 = vpop.f32.mrf.mxu1 }
 0x112   : > { %5412 = vst [vmem:[#allocation6_spill] sm:$0xff] %v5077_v61  ;;  %v584_v60 = vadd.f32 %v3823_v36, %v463_v16  ;;  %v591_v36 = vadd.f32 %v590_v7, %v469_v38 }
 0x113   : > { %v5079_v23 = vpop.f32.mrf.mxu0  ;;  %v5081_v15 = vpop.f32.mrf.mxu1 }
 0x114   : > { %v719_v7 = vadd.f32 %v5055_v3, %v591_v36 }
 0x115   : > { %v5083_v30 = vpop.f32.mrf.mxu0  ;;  %v5085_v20 = vpop.f32.mrf.mxu1 }
 0x116   : > { %5413 = vst [vmem:[#allocation7_spill] sm:$0xff] %v5083_v30  ;;  %v457_v30 = vadd.f32 %v5033_v51, %v313_v31  ;;  %v598_v51 = vadd.f32 %v3826_v5, %v475_v12 }
 0x117   : > { %v3884_v37 = vpop.f32.mrf.mxu0  ;;  %v5087_v26 = vpop.f32.mrf.mxu1  ;;  %v5422_v38 = vld [vmem:[#allocation5_spill] sm:$0xff] }
 0x118   : > { %5414 = vst [vmem:[#allocation8_spill] sm:$0xff] %v5087_v26  ;;  %v577_v62 = vadd.f32 %v576_v2, %v457_v30  ;;  %v844_v30 = vadd.f32 %v5075_v27, %v719_v7 }
 0x119   : > { %v1077_v24 = vpop.f32.mrf.mxu0  ;;  %v5089_v50 = vpop.f32.mrf.mxu1 }
 0x11a   : > { %5415 = vst [vmem:[#allocation9_spill] sm:$0xff] %v5089_v50  ;;  %v563_v50 = vadd.f32 %v562_v14, %v445_v40  ;;  %v711_v40 = vadd.f32 %v3839_v34, %v584_v60  ;;  %v703_v56 = vadd.f32 %v5051_v35, %v577_v62  ;;  %v727_v34 = vadd.f32 %v5053_v4, %v598_v51 }
 0x11b   : > { %v3887_v58 = vpop.f32.mrf.mxu0  ;;  %v5091_v44 = vpop.f32.mrf.mxu1 }
 0x11c   : > { %5416 = vst [vmem:[#allocation10_spill] sm:$0xff] %v5091_v44  ;;  %v687_v29 = vadd.f32 %v686_v49, %v563_v50  ;;  %v838_v49 = vadd.f32 %v3855_v32, %v711_v40  ;;  %v850_v47 = vadd.f32 %v3858_v22, %v727_v34 }
 0x11d   : > { %v5093_v39 = vpop.f32.mrf.mxu0  ;;  %v5095_v18 = vpop.f32.mrf.mxu1  ;;  %v5419_v60 = vld [vmem:[#allocation7_spill] sm:$0xff] }
 0x11e   : > { %5417 = vst [vmem:[#allocation11_spill] sm:$0xff] %v5095_v18  ;;  %v695_v18 = vadd.f32 %v3836_v41, %v570_v11  ;;  %v820_v31 = vadd.f32 %v819_v9, %v687_v29  ;;  %v487_v41 = vadd.f32 %v5041_v63, %v5047_v57  ;;  %v832_v63 = vadd.f32 %v831_v52, %v703_v56 }
 0x11f   : > { %v5097_v25 = vpop.f32.mrf.mxu0  ;;  %v5099_v10 = vpop.f32.mrf.mxu1  ;;  %v605_v9 = vadd.f32 %v5061_v45, %v481_v48  ;;  %v953_v32 = vadd.f32 %v5065_v33, %v838_v49  ;;  %v5420_v12 = vld [vmem:[#allocation8_spill] sm:$0xff] }
 0x120   : > { %5418 = vst [vmem:[#allocation12_spill] sm:$0xff] %v5097_v25  ;;  %v826_v54 = vadd.f32 %v3852_v0, %v695_v18  ;;  %v612_v46 = vadd.f32 %v3829_v42, %v487_v41  ;;  %v935_v5 = vadd.f32 %v5063_v59, %v820_v31  ;;  %v947_v52 = vadd.f32 %v5067_v21, %v832_v63  ;;  %v5424_v41 = vld [vmem:[#allocation6_spill] sm:$0xff] }
 0x121   : > { %v5101_v8 = vpop.f32.mrf.mxu0  ;;  %v5103_v61 = vpop.f32.mrf.mxu1  ;;  %v1108_v45 = vadd.f32 %v3887_v58, %v953_v32  ;;  %v959_v21 = vadd.f32 %v5071_v53, %v844_v30 }
 0x122   : > { %v941_v19 = vadd.f32 %v3868_v43, %v826_v54  ;;  %v1078_v13 = vadd.f32 %v1077_v24, %v935_v5  ;;  %v743_v42 = vadd.f32 %v5057_v6, %v612_v46  ;;  %v965_v6 = vadd.f32 %v5069_v1, %v850_v47 }
 0x123   : > { %v5105_v26 = vpop.f32.mrf.mxu0  ;;  %v5107_v44 = vpop.f32.mrf.mxu1  ;;  %v1098_v24 = vadd.f32 %v5093_v39, %v947_v52 }
 0x124   : > { %v1088_v57 = vadd.f32 %v3884_v37, %v941_v19  ;;  %v735_v37 = vadd.f32 %v5059_v28, %v605_v9  ;;  %v862_v50 = vadd.f32 %v5079_v23, %v743_v42  ;;  %v1229_v27 = vadd.f32 %v5085_v20, %v1078_v13 }
 0x125   : > { %v5110_v17 = vpop.f32.mrf.mxu0  ;;  %v5112_v25 = vpop.f32.mrf.mxu1  ;;  %v1247_v23 = vadd.f32 %v5420_v12, %v1108_v45  ;;  %v1118_v20 = vadd.f32 %v5101_v8, %v959_v21  ;;  %v5426_v5 = vld [vmem:[#allocation11_spill] sm:$0xff] }
 0x126   : > { %v1235_v3 = vadd.f32 %v5081_v15, %v1088_v57  ;;  %v856_v15 = vadd.f32 %v5419_v60, %v735_v37  ;;  %v977_v1 = vadd.f32 %v5422_v38, %v862_v50 }
 0x127   : > { %v3916_v55 = vpop.f32.mrf.mxu0  ;;  %v5118_v14 = vpop.f32.mrf.mxu1  ;;  %v5421_v29 = vld [vmem:[#allocation12_spill] sm:$0xff]  ;;  %v1253_v63 = vadd.f32 %v5426_v5, %v1118_v20 }
 0x128   : > { %v1354_v18 = vadd.f32 %v3916_v55, %v1235_v3  ;;  %v1128_v62 = vadd.f32 %v5421_v29, %v965_v6  ;;  %v5423_v55 = vld [vmem:[#allocation9_spill] sm:$0xff]  ;;  %v971_v36 = vadd.f32 %v5424_v41, %v856_v15  ;;  %v1148_v56 = vadd.f32 %v5105_v26, %v977_v1 }
 0x129   : > { %v1346_v16 = vpop.f32.mrf.mxu0  ;;  %v5122_v11 = vpop.f32.mrf.mxu1  ;;  %v1241_v51 = vadd.f32 %v5423_v55, %v1098_v24 }
 0x12a   : > { %v1347_v54 = vadd.f32 %v1346_v16, %v1229_v27  ;;  %v1479_v53 = vadd.f32 %v5107_v44, %v1354_v18  ;;  %v5425_v16 = vld [vmem:[#allocation10_spill] sm:$0xff]  ;;  %v1138_v57 = vadd.f32 %v5110_v17, %v971_v36  ;;  %v1271_v47 = vadd.f32 %v5099_v10, %v1148_v56 }
 0x12b   : > { %v3919_v2 = vpop.f32.mrf.mxu0  ;;  %v5127_v0 = vpop.f32.mrf.mxu1  ;;  %v1259_v48 = vadd.f32 %v5425_v16, %v1128_v62 }
 0x12c   : > { %v1368_v31 = vadd.f32 %v3919_v2, %v1247_v23  ;;  %v1471_v46 = vadd.f32 %v5112_v25, %v1347_v54 }
 0x12d   : > { %v1360_v35 = vpop.f32.mrf.mxu0  ;;  %v5133_v43 = vpop.f32.mrf.mxu1 }
 0x12e   : > { %v1361_v8 = vadd.f32 %v1360_v35, %v1241_v51  ;;  %v1495_v7 = vadd.f32 %v5118_v14, %v1368_v31  ;;  %v1265_v14 = vadd.f32 %v5103_v61, %v1138_v57 }
 0x12f   : > { %v3922_v4 = vpop.f32.mrf.mxu0  ;;  %v5138_v59 = vpop.f32.mrf.mxu1 }
 0x130   : > { %v1382_v9 = vadd.f32 %v3922_v4, %v1259_v48  ;;  %v1487_v25 = vadd.f32 %v5122_v11, %v1361_v8 }
 0x131   : > { %v1374_v33 = vpop.f32.mrf.mxu0  ;;  %v5144_v22 = vpop.f32.mrf.mxu1 }
 0x132   : > { %v1375_v35 = vadd.f32 %v1374_v33, %v1253_v63  ;;  %v1511_v10 = vadd.f32 %v5127_v0, %v1382_v9 }
 0x133   : > { %v3925_v58 = vpop.f32.mrf.mxu0  ;;  %v3964_v28 = vpop.f32.mrf.mxu1 }
 0x134   : > { %v1396_v3 = vadd.f32 %v3925_v58, %v1271_v47  ;;  %v1503_v33 = vadd.f32 %v5133_v43, %v1375_v35 }
 0x135   : > { %v1388_v40 = vpop.f32.mrf.mxu0  ;;  %v1718_v39 = vpop.f32.mrf.mxu1 }
 0x136   : > { %v1389_v6 = vadd.f32 %v1388_v40, %v1265_v14  ;;  %v1527_v0 = vadd.f32 %v5138_v59, %v1396_v3 }
 0x137   : > { %v3948_v19 = vpop.f32.mrf.mxu0  ;;  %v3967_v49 = vpop.f32.mrf.mxu1 }
 0x138   : > { %v1610_v34 = vadd.f32 %v3948_v19, %v1479_v53  ;;  %v1519_v43 = vadd.f32 %v5144_v22, %v1389_v6 }
 0x139   : > { %v1603_v44 = vpop.f32.mrf.mxu0  ;;  %v1730_v2 = vpop.f32.mrf.mxu1 }
 0x13a   : > { %v1725_v32 = vadd.f32 %v3964_v28, %v1610_v34  ;;  %v1604_v26 = vadd.f32 %v1603_v44, %v1471_v46 }
 0x13b   : > { %v3951_v13 = vpop.f32.mrf.mxu0  ;;  %v3970_v42 = vpop.f32.mrf.mxu1 }
 0x13c   : > { %1766 = vst.msk [vmem:[%s5169_s16 + $0x8] sm:$0xff] %vm1764_vm1, %v1725_v32  ;;  %v1719_v17 = vadd.f32 %v1718_v39, %v1604_v26  ;;  %v1622_v30 = vadd.f32 %v3951_v13, %v1495_v7 }
 0x13d   : > { %v1615_v4 = vpop.f32.mrf.mxu0  ;;  %v1742_v52 = vpop.f32.mrf.mxu1 }
 0x13e   : > { %1765 = vst.msk [vmem:[%s5169_s16] sm:$0xff] %vm1764_vm1, %v1719_v17  ;;  %v1737_v11 = vadd.f32 %v3967_v49, %v1622_v30  ;;  %v1616_v45 = vadd.f32 %v1615_v4, %v1487_v25 }
 0x13f   : > { %v3954_v37 = vpop.f32.mrf.mxu0  ;;  %v3973_v50 = vpop.f32.mrf.mxu1 }
 0x140   : > { %1768 = vst.msk [vmem:[%s5169_s16 + $0x18] sm:$0xff] %vm1764_vm1, %v1737_v11  ;;  %v1731_v27 = vadd.f32 %v1730_v2, %v1616_v45  ;;  %v1634_v61 = vadd.f32 %v3954_v37, %v1511_v10 }
 0x141   : > { %v1627_v24 = vpop.f32.mrf.mxu0  ;;  %v1754_v18 = vpop.f32.mrf.mxu1 }
 0x142   : > { %1767 = vst.msk [vmem:[%s5169_s16 + $0x10] sm:$0xff] %vm1764_vm1, %v1731_v27  ;;  %v1749_v21 = vadd.f32 %v3970_v42, %v1634_v61  ;;  %v1628_v60 = vadd.f32 %v1627_v24, %v1503_v33 }
 0x143   : > { %v3957_v15 = vpop.f32.mrf.mxu0  ;;  %v5183_v58 = vpop.f32.mrf.mxu1 }
 0x144   : > { %1770 = vst.msk [vmem:[%s5169_s16 + $0x28] sm:$0xff] %vm1764_vm1, %v1749_v21  ;;  %v1743_v28 = vadd.f32 %v1742_v52, %v1628_v60  ;;  %v1646_v12 = vadd.f32 %v3957_v15, %v1527_v0 }
 0x145   : > { %v1639_v23 = vpop.f32.mrf.mxu0  ;;  %v5188_v29 = vpop.f32.mrf.mxu1 }
 0x146   : > { %1769 = vst.msk [vmem:[%s5169_s16 + $0x20] sm:$0xff] %vm1764_vm1, %v1743_v28  ;;  %v1761_v59 = vadd.f32 %v3973_v50, %v1646_v12  ;;  %v1640_v62 = vadd.f32 %v1639_v23, %v1519_v43 }
 0x147   : > { %v3980_v54 = vpop.f32.mrf.mxu0  ;;  %v5192_v38 = vpop.f32.mrf.mxu1 }
 0x148   : > { %1772 = vst.msk [vmem:[%s5169_s16 + $0x38] sm:$0xff] %vm1764_vm1, %v1761_v59  ;;  %v1755_v1 = vadd.f32 %v1754_v18, %v1640_v62  ;;  %v2050_v23 = vadd.f32 %v5183_v58, %v3980_v54 }
 0x149   : > { %v1892_v20 = vpop.f32.mrf.mxu0  ;;  %v5196_v40 = vpop.f32.mrf.mxu1 }
 0x14a   : > { %1771 = vst.msk [vmem:[%s5169_s16 + $0x30] sm:$0xff] %vm1764_vm1, %v1755_v1  ;;  %v2044_v1 = vadd.f32 %v5188_v29, %v1892_v20 }
 0x14b   : > { %v3983_v22 = vpop.f32.mrf.mxu0  ;;  %v4002_v39 = vpop.f32.mrf.mxu1 }
 0x14d   : > { %v5200_v55 = vpop.f32.mrf.mxu0  ;;  %v5202_v51 = vpop.f32.mrf.mxu1 }
 0x14e   : > { %v2056_v58 = vadd.f32 %v5196_v40, %v5200_v55 }
 0x14f   : > { %v3986_v53 = vpop.f32.mrf.mxu0  ;;  %v4005_v31 = vpop.f32.mrf.mxu1 }
 0x150   : > { %v5204_v41 = vadd.f32 %v4002_v39, %v3986_v53 }
 0x151   : > { %v5206_v36 = vpop.f32.mrf.mxu0  ;;  %v5208_v56 = vpop.f32.mrf.mxu1 }
 0x153   : > { %v3989_v19 = vpop.f32.mrf.mxu0  ;;  %v4028_v49 = vpop.f32.mrf.mxu1 }
 0x154   : > { %v5210_v16 = vadd.f32 %v4005_v31, %v3989_v19  ;;  %v2062_v19 = vadd.f32 %v5192_v38, %v3983_v22 }
 0x155   : > { %v5212_v48 = vpop.f32.mrf.mxu0  ;;  %v2285_v46 = vpop.f32.mrf.mxu1 }
 0x157   : > { %v4012_v8 = vpop.f32.mrf.mxu0  ;;  %v4031_v34 = vpop.f32.mrf.mxu1 }
 0x158   : > { %v2169_v39 = vadd.f32 %v4012_v8, %v2050_v23  ;;  %v2068_v23 = vadd.f32 %v5202_v51, %v5206_v36  ;;  %v2080_v51 = vadd.f32 %v5208_v56, %v5212_v48 }
 0x159   : > { %v2161_v5 = vpop.f32.mrf.mxu0  ;;  %v5214_v63 = vpop.f32.mrf.mxu1 }
 0x15a   : > { %v2294_v54 = vadd.f32 %v4028_v49, %v2169_v39 }
 0x15b   : > { %v4015_v57 = vpop.f32.mrf.mxu0  ;;  %v5216_v44 = vpop.f32.mrf.mxu1 }
 0x15d   : > { %v2175_v2 = vpop.f32.mrf.mxu0  ;;  %v5218_v7 = vpop.f32.mrf.mxu1 }
 0x15e   : > { %v2176_v20 = vadd.f32 %v2175_v2, %v2056_v58 }
 0x15f   : > { %v4018_v9 = vpop.f32.mrf.mxu0  ;;  %v5220_v32 = vpop.f32.mrf.mxu1 }
 0x161   : > { %v2189_v26 = vpop.f32.mrf.mxu0  ;;  %v5222_v47 = vpop.f32.mrf.mxu1 }
 0x162   : > { %v2190_v40 = vadd.f32 %v2189_v26, %v2068_v23 }
 0x163   : > { %v5224_v13 = vpop.f32.mrf.mxu0  ;;  %v4060_v42 = vpop.f32.mrf.mxu1 }
 0x165   : > { %v5226_v25 = vpop.f32.mrf.mxu0  ;;  %v2533_v35 = vpop.f32.mrf.mxu1 }
 0x167   : > { %v4044_v17 = vpop.f32.mrf.mxu0  ;;  %v5228_v30 = vpop.f32.mrf.mxu1 }
 0x168   : > { %v2425_v8 = vadd.f32 %v4044_v17, %v2294_v54 }
 0x169   : > { %v2418_v14 = vpop.f32.mrf.mxu0  ;;  %v5230_v4 = vpop.f32.mrf.mxu1 }
 0x16a   : > { %v2540_v39 = vadd.f32 %v4060_v42, %v2425_v8  ;;  %v2204_v42 = vadd.f32 %v5226_v25, %v2080_v51 }
 0x16b   : > { %v4047_v52 = vpop.f32.mrf.mxu0  ;;  %v5232_v10 = vpop.f32.mrf.mxu1 }
 0x16d   : > { %v2430_v3 = vpop.f32.mrf.mxu0  ;;  %v5234_v11 = vpop.f32.mrf.mxu1 }
 0x16f   : > { %v4050_v45 = vpop.f32.mrf.mxu0  ;;  %v5236_v37 = vpop.f32.mrf.mxu1 }
 0x170   : > { %5427 = vst [vmem:[#allocation7_spill] sm:$0xff] %v5236_v37 }
 0x171   : > { %v2442_v50 = vpop.f32.mrf.mxu0  ;;  %v5238_v33 = vpop.f32.mrf.mxu1 }
 0x172   : > { %5428 = vst [vmem:[#allocation8_spill] sm:$0xff] %v5238_v33  ;;  %v2162_v33 = vadd.f32 %v2161_v5, %v2044_v1 }
 0x173   : > { %v5240_v6 = vpop.f32.mrf.mxu0  ;;  %v4092_v27 = vpop.f32.mrf.mxu1 }
 0x174   : > { %v2286_v29 = vadd.f32 %v2285_v46, %v2162_v33 }
 0x175   : > { %v5242_v61 = vpop.f32.mrf.mxu0  ;;  %v5244_v24 = vpop.f32.mrf.mxu1 }
 0x176   : > { %v2419_v1 = vadd.f32 %v2418_v14, %v2286_v29 }
 0x177   : > { %v4076_v18 = vpop.f32.mrf.mxu0  ;;  %v5246_v0 = vpop.f32.mrf.mxu1 }
 0x178   : > { %v2534_v36 = vadd.f32 %v2533_v35, %v2419_v1 }
 0x179   : > { %v2676_v21 = vpop.f32.mrf.mxu0  ;;  %v5248_v60 = vpop.f32.mrf.mxu1  ;;  %v5436_v1 = vld [vmem:[#allocation8_spill] sm:$0xff] }
 0x17a   : > { %5429 = vst [vmem:[#allocation12_spill] sm:$0xff] %v5248_v60 }
 0x17b   : > { %v4079_v15 = vpop.f32.mrf.mxu0  ;;  %v5250_v43 = vpop.f32.mrf.mxu1 }
 0x17c   : > { %5430 = vst [vmem:[#allocation5_spill] sm:$0xff] %v5250_v43 }
 0x17d   : > { %v2696_v28 = vpop.f32.mrf.mxu0  ;;  %v5252_v12 = vpop.f32.mrf.mxu1 }
 0x17e   : > { %5431 = vst [vmem:[#allocation9_spill] sm:$0xff] %v5252_v12  ;;  %v2183_v12 = vadd.f32 %v4015_v57, %v2062_v19  ;;  %v2302_v57 = vadd.f32 %v5214_v63, %v2176_v20 }
 0x17f   : > { %v5255_v59 = vpop.f32.mrf.mxu0  ;;  %v5257_v62 = vpop.f32.mrf.mxu1 }
 0x180   : > { %5432 = vst [vmem:[#allocation6_spill] sm:$0xff] %v5257_v62  ;;  %v2310_v5 = vadd.f32 %v4031_v34, %v2183_v12  ;;  %v2431_v33 = vadd.f32 %v2430_v3, %v2302_v57  ;;  %v2687_v34 = vadd.f32 %v4076_v18, %v2540_v39  ;;  %v2677_v12 = vadd.f32 %v2676_v21, %v2534_v36 }
 0x181   : > { %v5260_v53 = vpop.f32.mrf.mxu0  ;;  %v5262_v31 = vpop.f32.mrf.mxu1  ;;  %v5434_v20 = vld [vmem:[#allocation12_spill] sm:$0xff] }
 0x182   : > { %5433 = vst [vmem:[#allocation10_spill] sm:$0xff] %v5262_v31  ;;  %v2197_v31 = vadd.f32 %v4018_v9, %v5204_v41  ;;  %v2437_v46 = vadd.f32 %v4047_v52, %v2310_v5  ;;  %v2318_v41 = vadd.f32 %v5218_v7, %v2190_v40  ;;  %v2211_v9 = vadd.f32 %v5224_v13, %v5210_v16 }
 0x183   : > { %v5265_v43 = vpop.f32.mrf.mxu0  ;;  %v4124_v37 = vpop.f32.mrf.mxu1  ;;  %v2834_v3 = vadd.f32 %v4092_v27, %v2687_v34  ;;  %v2828_v25 = vadd.f32 %v5244_v24, %v2677_v12  ;;  %v5437_v57 = vld [vmem:[#allocation5_spill] sm:$0xff] }
 0x184   : > { %v2326_v14 = vadd.f32 %v5216_v44, %v2197_v31  ;;  %v2552_v52 = vadd.f32 %v5228_v30, %v2437_v46  ;;  %v2443_v56 = vadd.f32 %v2442_v50, %v2318_v41  ;;  %v2546_v44 = vadd.f32 %v5230_v4, %v2431_v33 }
 0x185   : > { %v5269_v60 = vpop.f32.mrf.mxu0  ;;  %v5271_v62 = vpop.f32.mrf.mxu1  ;;  %v2342_v18 = vadd.f32 %v5220_v32, %v2211_v9  ;;  %v2334_v31 = vadd.f32 %v5222_v47, %v2204_v42  ;;  %v5438_v39 = vld [vmem:[#allocation9_spill] sm:$0xff] }
 0x186   : > { %v2449_v19 = vadd.f32 %v4050_v45, %v2326_v14  ;;  %v2707_v7 = vadd.f32 %v4079_v15, %v2552_v52  ;;  %v2697_v30 = vadd.f32 %v2696_v28, %v2546_v44  ;;  %v2558_v50 = vadd.f32 %v5234_v11, %v2443_v56  ;;  %v5435_v11 = vld [vmem:[#allocation7_spill] sm:$0xff] }
 0x187   : > { %v4108_v38 = vpop.f32.mrf.mxu0  ;;  %v5275_v22 = vpop.f32.mrf.mxu1  ;;  %v2461_v58 = vadd.f32 %v5240_v6, %v2342_v18  ;;  %v2455_v15 = vadd.f32 %v5242_v61, %v2334_v31  ;;  %v5439_v52 = vld [vmem:[#allocation6_spill] sm:$0xff] }
 0x188   : > { %v2953_v21 = vadd.f32 %v4108_v38, %v2834_v3  ;;  %v2564_v45 = vadd.f32 %v5232_v10, %v2449_v19  ;;  %v2846_v32 = vadd.f32 %v5246_v0, %v2707_v7  ;;  %v2717_v47 = vadd.f32 %v5260_v53, %v2558_v50 }
 0x189   : > { %v2945_v55 = vpop.f32.mrf.mxu0  ;;  %v5278_v49 = vpop.f32.mrf.mxu1  ;;  %v2840_v8 = vadd.f32 %v5434_v20, %v2697_v30  ;;  %v2576_v38 = vadd.f32 %v5435_v11, %v2461_v58  ;;  %v2570_v40 = vadd.f32 %v5436_v1, %v2455_v15  ;;  %v5440_v56 = vld [vmem:[#allocation10_spill] sm:$0xff] }
 0x18a   : > { %v2946_v54 = vadd.f32 %v2945_v55, %v2828_v25  ;;  %v2727_v29 = vadd.f32 %v5255_v59, %v2564_v45  ;;  %v3078_v10 = vadd.f32 %v4124_v37, %v2953_v21  ;;  %v2852_v53 = vadd.f32 %v5438_v39, %v2717_v47 }
 0x18b   : > { %v4111_v2 = vpop.f32.mrf.mxu0  ;;  %v5281_v17 = vpop.f32.mrf.mxu1  ;;  %v2747_v46 = vadd.f32 %v5265_v43, %v2576_v38  ;;  %v2737_v37 = vadd.f32 %v5269_v60, %v2570_v40 }
 0x18c   : > { %v2967_v23 = vadd.f32 %v4111_v2, %v2846_v32  ;;  %v3070_v61 = vadd.f32 %v5271_v62, %v2946_v54  ;;  %v2858_v59 = vadd.f32 %v5437_v57, %v2727_v29 }
 0x18d   : > { %v2959_v26 = vpop.f32.mrf.mxu0  ;;  %v5289_v63 = vpop.f32.mrf.mxu1  ;;  %v2870_v43 = vadd.f32 %v5439_v52, %v2747_v46  ;;  %v2864_v60 = vadd.f32 %v5440_v56, %v2737_v37 }
 0x18e   : > { %v2960_v0 = vadd.f32 %v2959_v26, %v2840_v8  ;;  %v3094_v2 = vadd.f32 %v5275_v22, %v2967_v23 }
 0x18f   : > { %v4114_v48 = vpop.f32.mrf.mxu0  ;;  %v5293_v35 = vpop.f32.mrf.mxu1 }
 0x190   : > { %v2981_v14 = vadd.f32 %v4114_v48, %v2858_v59  ;;  %v3086_v62 = vadd.f32 %v5278_v49, %v2960_v0 }
 0x191   : > { %v2973_v16 = vpop.f32.mrf.mxu0  ;;  %v5297_v13 = vpop.f32.mrf.mxu1 }
 0x192   : > { %v2974_v26 = vadd.f32 %v2973_v16, %v2852_v53  ;;  %v3110_v48 = vadd.f32 %v5281_v17, %v2981_v14 }
 0x193   : > { %v4117_v4 = vpop.f32.mrf.mxu0  ;;  %v4156_v27 = vpop.f32.mrf.mxu1 }
 0x194   : > { %v3102_v18 = vadd.f32 %v5289_v63, %v2974_v26  ;;  %v2995_v49 = vadd.f32 %v4117_v4, %v2870_v43 }
 0x195   : > { %v2987_v24 = vpop.f32.mrf.mxu0  ;;  %v3317_v28 = vpop.f32.mrf.mxu1 }
 0x196   : > { %v2988_v16 = vadd.f32 %v2987_v24, %v2864_v60  ;;  %v3126_v58 = vadd.f32 %v5293_v35, %v2995_v49 }
 0x197   : > { %v4140_v6 = vpop.f32.mrf.mxu0  ;;  %v4159_v5 = vpop.f32.mrf.mxu1 }
 0x198   : > { %v3209_v55 = vadd.f32 %v4140_v6, %v3078_v10 }
 0x199   : > { %v3202_v51 = vpop.f32.mrf.mxu0  ;;  %v3329_v36 = vpop.f32.mrf.mxu1 }
 0x19a   : > { %v3324_v33 = vadd.f32 %v4156_v27, %v3209_v55  ;;  %v3203_v34 = vadd.f32 %v3202_v51, %v3070_v61  ;;  %v3118_v27 = vadd.f32 %v5297_v13, %v2988_v16 }
 0x19b   : > { %v4143_v41 = vpop.f32.mrf.mxu0  ;;  %v4162_v9 = vpop.f32.mrf.mxu1 }
 0x19c   : > { %v3221_v42 = vadd.f32 %v4143_v41, %v3094_v2  ;;  %3373 = vrot.lane.b32.xlu0 %v3324_v33, %s4302_s18  ;;  %v3318_v44 = vadd.f32 %v3317_v28, %v3203_v34 }
 0x19d   : > { %v3214_v12 = vpop.f32.mrf.mxu0  ;;  %v3341_v19 = vpop.f32.mrf.mxu1 }
 0x19e   : > { %v3336_v22 = vadd.f32 %v4159_v5, %v3221_v42  ;;  %v3215_v3 = vadd.f32 %v3214_v12, %v3086_v62 }
 0x19f   : > { %v4146_v7 = vpop.f32.mrf.mxu0  ;;  %v4165_v25 = vpop.f32.mrf.mxu1 }
 0x1a0   : > { %3377 = vrot.lane.b32.xlu1 %v3336_v22, %s4302_s18  ;;  %3371 = vrot.lane.b32.xlu0 %v3318_v44, %s4302_s18  ;;  %v3330_v30 = vadd.f32 %v3329_v36, %v3215_v3  ;;  %v3233_v21 = vadd.f32 %v4146_v7, %v3110_v48 }
 0x1a1   : > { %v3226_v31 = vpop.f32.mrf.mxu0  ;;  %v3353_v4 = vpop.f32.mrf.mxu1 }
 0x1a2   : > { %v3227_v45 = vadd.f32 %v3226_v31, %v3102_v18  ;;  %v3348_v15 = vadd.f32 %v4162_v9, %v3233_v21 }
 0x1a3   : > { %v4149_v50 = vpop.f32.mrf.mxu0 }
 0x1a4   : > { %v3342_v17 = vadd.f32 %v3341_v19, %v3227_v45  ;;  %3375 = vrot.lane.b32.xlu1 %v3330_v30, %s4302_s18  ;;  %v3245_v32 = vadd.f32 %v4149_v50, %v3126_v58 }
 0x1a5   : > { %v3238_v63 = vpop.f32.mrf.mxu0 }
 0x1a6   : > { %v3239_v54 = vadd.f32 %v3238_v63, %v3118_v27  ;;  %3379 = vrot.lane.b32.xlu0 %v3342_v17, %s4302_s18  ;;  %v3360_v35 = vadd.f32 %v4165_v25, %v3245_v32 }
 0x1a8   : > { %v3354_v29 = vadd.f32 %v3353_v4, %v3239_v54  ;;  %3381 = vrot.lane.b32.xlu1 %v3348_v15, %s4302_s18 }
 0x1aa   : > { %3383 = vrot.lane.b32.xlu0 %v3354_v29, %s4302_s18 }
 0x1ac   : > { %3385 = vrot.lane.b32.xlu1 %v3360_v35, %s4302_s18 }
 0x20e   : > { %v3374_v13 = vpop.permute.xlu0 %3373 }
 0x20f   : > { %3397 = vst.msk [vmem:[%s5169_s16 + $0x8] sm:$0xff] %vm3395_vm2, %v3374_v13 }
 0x212   : > { %v3378_v47 = vpop.permute.xlu1 %3377  ;;  %v3372_v24 = vpop.permute.xlu0 %3371 }
 0x213   : > { %3399 = vst.msk [vmem:[%s5169_s16 + $0x18] sm:$0xff] %vm3395_vm2, %v3378_v47  ;;  %3396 = vst.msk [vmem:[%s5169_s16] sm:$0xff] %vm3395_vm2, %v3372_v24 }
 0x216   : > { %v3376_v28 = vpop.permute.xlu1 %3375 }
 0x217   : > { %3398 = vst.msk [vmem:[%s5169_s16 + $0x10] sm:$0xff] %vm3395_vm2, %v3376_v28 }
 0x218   : > { %v3380_v20 = vpop.permute.xlu0 %3379 }
 0x219   : > { %3400 = vst.msk [vmem:[%s5169_s16 + $0x20] sm:$0xff] %vm3395_vm2, %v3380_v20 }
 0x21a   : > { %v3382_v8 = vpop.permute.xlu1 %3381 }
 0x21b   : > { %3401 = vst.msk [vmem:[%s5169_s16 + $0x28] sm:$0xff] %vm3395_vm2, %v3382_v8 }
 0x21c   : > { %v3384_v10 = vpop.permute.xlu0 %3383 }
 0x21d   : > { %3402 = vst.msk [vmem:[%s5169_s16 + $0x30] sm:$0xff] %vm3395_vm2, %v3384_v10 }
 0x21e   : > { %v3386_v23 = vpop.permute.xlu1 %3385 }
 0x21f   : > { %3403 = vst.msk [vmem:[%s5169_s16 + $0x38] sm:$0xff] %vm3395_vm2, %v3386_v23 }
 0x220   : > { %4237 = shalt.err (!%p4234_p5)
}
 0x221   : > { %s4238_s3 = scalar_lea.hbm %s5349_s26, 1024  ;;  %s4242_s6 = scalar_lea.hbm %s5406_s2, 2048 }
 0x222   : > { %p4239_p6 = scmp.ne.s32.totalorder %s5349_s26, %s4238_s3  ;;  %p4243_p10 = scmp.lt.s32.totalorder %s5349_s26, %s5406_s2 }
 0x223   : > { %p4244_p11 = scmp.lt.s32.totalorder %s4242_s6, %s4238_s3 }
 0x224   : > { %p4240_p7 = pnand %p4239_p6, %p4361_p4 }
 0x225   : > { %p4245_p12 = por %p4244_p11, %p4243_p10 }
 0x226   : > { %p4241_p9 = pneg %p4240_p7 }
 0x228   : > { %p4246_p13 = pnand %p4245_p12, %p4241_p9 }
 0x22a   : > { %4249 = shalt.err (!%p4246_p13)
}
 0x22b   : > { %s4304_s15 = smov 128   ;;  %s4305_s16 = smov 8  }
 0x22c   : > { %4166 = dma.vmem_to_hbm [thread:$0]  (%p4361_p4), %s5351_s23, 1024, %s5349_s26, %s5359_s12, %s4304_s15, %s4304_s15, %s4305_s16  }
 0x22d PF: > { %p4172_p0 = scmp.ge.s32.totalorder %s4300_s14, 2  ;;  %s3435_s18 = sand.u32 1, %s4280_s9  }
 0x22e   : > { %s3436_s20 = scalar_lea.sflag [#allocation3], %s3435_s18 }
 0x22f   : > { %p4169_p1 = pnand %p4172_p0, %p4368_p8 }
 0x231   : > { %p4170_p2 = pneg %p4169_p1 }
 0x233   : > { %4275 = dma.done.wait (%p4170_p2), %s3436_s20, 1024  }
 0x234   : > { %4277 = vsyncadd (%p4170_p2), %s3436_s20, 4294966272  ;;  %s15_s14 = sadd.s32 1, %s4300_s14   ;;  %s5441_s9 = smov %s4284_s10 }
 0x235   : > { %p12_p3 = scmp.ge.s32.totalorder %s15_s14, 4   ;;  %s5442_s10 = smov %s4288_s11 }
 0x236   : > { %s5443_s11 = smov %s4374_s22  ;;  %s5444_s12 = smov %s4296_s13 }
 0x237   : > { %s5445_s13 = smov %s5447_s17  ;;  %14 = sbr.rel (!%p12_p3) target bundleno = 4 (0x4), region = 67 }
 0x23c   :  { %3441 = vsyncpa [#allocation3], 1 }
 0x23d   :  { %3443 = vsyncpa [#allocation3 + $0x1], 1 }

</bundles_post_ra>
